<compile_context>
chip_gen: v7x
topology: tpu7x:2x2x1
jax: 0.10.0
libtpu: 0.0.40
codegen_flags: <defaults>
</compile_context>

<pallas_src>
import jax
import jax.numpy as jnp
from jax.experimental import pallas as pl
from jax.experimental.pallas import tpu as pltpu


def _round_up(x, m):
    return ((x + m - 1) // m) * m


def _choose_tile(n, t_max, gran):
    """Largest tile <= t_max (multiple of `gran`) that bounds pad waste to < gran
    rows per tile (instead of rounding n up to a full t_max tile)."""
    nt = max(1, -(-n // t_max))
    t = _round_up(-(-n // nt), gran)
    return t, nt * t


# ----------------------------------------------------------------------------
# Kernel 1: fused  (bert_outs @ W^T + b) + word_embeddings
#   - HBM-bandwidth bound: adaptive token tile up to 2048 rows, explicit VMEM limit
#   - word embeddings passed UNPADDED ([tm, 100]); 100 -> 128 lane pad happens
#     in VMEM inside the kernel (no extra HBM pass for the pad)
#   - bert / W in bf16 (memory-bound), f32 accumulate + add, 128-lane f32 output
#     (bf16 output would save another ~20% traffic if downstream tolerates it)
# ----------------------------------------------------------------------------
def linear_add_kernel(bert_ref, w_ref, b_ref, wemb_ref, out_ref):
    # bert_ref: [TM, 768] bf16, w_ref: [768, 128] bf16, b_ref: [1, 128] f32,
    # wemb_ref: [TM, 100] f32 (unpadded lanes), out_ref: [TM, 128] f32
    y = jnp.dot(bert_ref[...], w_ref[...], preferred_element_type=jnp.float32)
    tm = wemb_ref.shape[0]
    pad_w = out_ref.shape[1] - wemb_ref.shape[1]
    wemb = jnp.concatenate(
        [wemb_ref[...], jnp.zeros((tm, pad_w), jnp.float32)], axis=1)
    out_ref[...] = y + b_ref[...] + wemb


def linear_add(bert_flat_bf16, w_t_bf16, b_2d, wemb_flat, tm_max=2048):
    M, D_in = bert_flat_bf16.shape
    D_out = w_t_bf16.shape[1]                     # 128 (lane-padded)
    D_w = wemb_flat.shape[1]                      # 100 (unpadded)
    tm, M_pad = _choose_tile(M, tm_max, 256)      # adaptive tile, bounded pad waste
    if M_pad != M:
        bert_flat_bf16 = jnp.pad(bert_flat_bf16, ((0, M_pad - M), (0, 0)))
        wemb_flat = jnp.pad(wemb_flat, ((0, M_pad - M), (0, 0)))

    out = pl.pallas_call(
        linear_add_kernel,
        out_shape=jax.ShapeDtypeStruct((M_pad, D_out), jnp.float32),
        grid=(M_pad // tm,),
        in_specs=[
            pl.BlockSpec((tm, D_in), lambda i: (i, 0)),        # streamed token tiles
            pl.BlockSpec((D_in, D_out), lambda i: (0, 0)),     # weights resident
            pl.BlockSpec((1, D_out), lambda i: (0, 0)),        # bias resident
            pl.BlockSpec((tm, D_w), lambda i: (i, 0)),         # word-embed tiles (no pad)
        ],
        out_specs=pl.BlockSpec((tm, D_out), lambda i: (i, 0)),
        compiler_params=pltpu.CompilerParams(
            dimension_semantics=("parallel",),                 # 2 TCs on v7x
            vmem_limit_bytes=32 * 1024 * 1024),                # > v5e's 16 MiB default
        cost_estimate=pl.CostEstimate(
            flops=2 * M_pad * D_in * D_out,
            transcendentals=0,
            bytes_accessed=(M_pad * D_in * 2 + D_in * D_out * 2
                            + M_pad * D_w * 4 + M_pad * D_out * 4 + D_out * 4)),
    )(bert_flat_bf16, w_t_bf16, b_2d, wemb_flat)
    return out[:M]


# ----------------------------------------------------------------------------
# Kernel 2: CharLSTM — bidirectional single-layer LSTM, final hidden per word.
# Sorting + pack_padded_sequence + un-sort is replaced by length masking
# (numerically identical for the returned final states).
#   - both directions merged into ONE recurrence of L steps:
#       hidden/cell are [N, 2H] = [fwd | bwd], Whh is block-diagonal [2H, 8H],
#       fwd gates read gx at time s, bwd gates read gx at time L-1-s
#     (grid=(dirs,) would serialize 2L steps on single-TC v5e/v6e)
#   - grid tiles over words (N), marked "parallel" -> bounded VMEM, v7x 2-TC use
#   - input projection hoisted as one big bf16 MXU matmul into a VMEM scratch
#   - recurrence fully unrolled with STATIC gx indices (python loop over range(L))
#   - gate column layout (i | f | o | g), each 2H wide = [fwd H | bwd H]
#     -> contiguous sigmoid / tanh slices, no per-direction un-interleave
#   - 128-lane-padded output; lanes [0:H]=fwd final h, [H:2H]=bwd final h
# ----------------------------------------------------------------------------
def char_bilstm_kernel(emb_ref, len_ref, wx_ref, wh_ref, b_ref, out_ref, gx_ref):
    # emb_ref: [L, TN, D] bf16 time-major char embeddings (this word tile)
    # len_ref: [TN, 1] int32 char-sequence lengths
    # wx_ref:  [D, 8H] bf16 input->gate weights, columns (i_f,i_b,f_f,f_b,o_f,o_b,g_f,g_b)
    # wh_ref:  [2H, 8H] f32 block-diagonal hidden->gate weights
    # b_ref:   [1, 8H] f32 combined bias
    # out_ref: [TN, 128] final hidden in lanes [0:2H], zeros elsewhere
    # gx_ref:  VMEM scratch [L, TN, 8H] f32 hoisted input projection
    L, TN, D = emb_ref.shape
    H2, G = wh_ref.shape                                  # 2H, 8H
    H = H2 // 2

    # Hoisted input projection: one large MXU matmul for every timestep at once.
    emb_flat = emb_ref[...].reshape(L * TN, D)
    gx_ref[...] = jnp.dot(emb_flat, wx_ref[...],
                          preferred_element_type=jnp.float32).reshape(L, TN, G)

    wh = wh_ref[...]
    b = b_ref[...]
    lens = len_ref[...]                                   # [TN, 1] int32
    # lane mask: within each 2H gate block, first H lanes belong to the fwd direction
    half = (jax.lax.broadcasted_iota(jnp.int32, (1, G), 1) % H2) < H
    half_h = half[:, :H2]                                 # [1, 2H]: fwd lanes of hidden

    h = jnp.zeros((TN, H2), jnp.float32)
    c = jnp.zeros((TN, H2), jnp.float32)
    for s in range(L):                                    # static unroll, static gx indices
        t_b = L - 1 - s
        x_gates = jnp.where(half, gx_ref[s], gx_ref[t_b])             # [TN, 8H]
        gates = x_gates + jnp.dot(h, wh, preferred_element_type=jnp.float32) + b
        sg = jax.nn.sigmoid(gates[:, :3 * H2])            # i, f, o (contiguous)
        gg = jnp.tanh(gates[:, 3 * H2:])                  # g
        i_g = sg[:, 0:H2]
        f_g = sg[:, H2:2 * H2]
        o_g = sg[:, 2 * H2:3 * H2]
        c_new = f_g * c + i_g * gg
        h_new = o_g * jnp.tanh(c_new)
        valid = jnp.where(half_h, s < lens, t_b < lens)   # [TN, 2H] per-direction mask
        h = jnp.where(valid, h_new, h)
        c = jnp.where(valid, c_new, c)

    pad_w = out_ref.shape[1] - H2
    out_ref[...] = jnp.concatenate(
        [h, jnp.zeros((TN, pad_w), jnp.float32)], axis=1)


def char_bilstm(emb_tm_bf16, lens_2d, wx, wh, b, tn_max=512):
    # emb_tm_bf16: [L, N, D] bf16; wx: [D, 8H] bf16; wh: [2H, 8H] f32; b: [1, 8H] f32
    L, N, D = emb_tm_bf16.shape
    G = wx.shape[1]
    H2 = wh.shape[0]
    OUT_PAD = max(128, _round_up(H2, 128))
    tn, N_pad = _choose_tile(N, tn_max, 16)
    if N_pad != N:
        emb_tm_bf16 = jnp.pad(emb_tm_bf16, ((0, 0), (0, N_pad - N), (0, 0)))
        lens_2d = jnp.pad(lens_2d, ((0, N_pad - N), (0, 0)))   # len 0 -> h stays 0

    out = pl.pallas_call(
        char_bilstm_kernel,
        out_shape=jax.ShapeDtypeStruct((N_pad, OUT_PAD), jnp.float32),
        grid=(N_pad // tn,),
        in_specs=[
            pl.BlockSpec((L, tn, D), lambda n: (0, n, 0)),      # streamed word tiles
            pl.BlockSpec((tn, 1), lambda n: (n, 0)),
            pl.BlockSpec((D, G), lambda n: (0, 0)),             # weights resident
            pl.BlockSpec((H2, G), lambda n: (0, 0)),
            pl.BlockSpec((1, G), lambda n: (0, 0)),
        ],
        out_specs=pl.BlockSpec((tn, OUT_PAD), lambda n: (n, 0)),
        scratch_shapes=[pltpu.VMEM((L, tn, G), jnp.float32)],
        compiler_params=pltpu.CompilerParams(
            dimension_semantics=("parallel",),                   # word tiles on 2 TCs (v7x)
            vmem_limit_bytes=48 * 1024 * 1024),
        cost_estimate=pl.CostEstimate(
            flops=2 * L * N_pad * G * (D + H2),
            transcendentals=L * N_pad * (G + H2),
            bytes_accessed=(L * N_pad * D * 2 + N_pad * 4 + D * G * 2
                            + H2 * G * 4 + G * 4 + N_pad * OUT_PAD * 4)),
    )(emb_tm_bf16, lens_2d, wx, wh, b)

    # [N, 2H]: lanes [0:H] = final forward hidden, [H:2H] = final backward hidden
    return out[:N, :H2]


def _merge_bilstm_params(Wih_f, Whh_f, bih_f, bhh_f, Wih_b, Whh_b, bih_b, bhh_b):
    """Build merged-direction weights.

    torch gate row order is (i, f, g, o); target gate-type order is (i, f, o, g)
    so sigmoid/tanh act on contiguous column slices.  Each gate-type block is 2H
    wide: [fwd H | bwd H], matching the hidden layout h = [h_f | h_b]."""
    H = Whh_f.shape[1]
    order = (0, 1, 3, 2)                      # i, f, o, g (torch indices)

    def cols(W, g):                           # rows of gate g, transposed to columns
        return W[g * H:(g + 1) * H].T

    wx = jnp.concatenate(
        [blk for g in order for blk in (cols(Wih_f, g), cols(Wih_b, g))], axis=1)

    b_f = bih_f + bhh_f
    b_b = bih_b + bhh_b
    b = jnp.concatenate(
        [blk for g in order
         for blk in (b_f[g * H:(g + 1) * H], b_b[g * H:(g + 1) * H])]).reshape(1, -1)

    wh = jnp.zeros((2 * H, 8 * H), jnp.float32)
    for k, g in enumerate(order):
        wh = wh.at[:H, (2 * k) * H:(2 * k + 1) * H].set(cols(Whh_f, g))
        wh = wh.at[H:, (2 * k + 1) * H:(2 * k + 2) * H].set(cols(Whh_b, g))

    return wx.astype(jnp.bfloat16), wh, b


# ----------------------------------------------------------------------------
# InputLayer.forward wrapper (glue around the two Pallas kernels)
# ----------------------------------------------------------------------------
def input_layer_forward(words, bert_outs, char_idxs, word_lens,
                        word_table, char_table, lin_w, lin_b,
                        Wih_f, Whh_f, bih_f, bhh_f,
                        Wih_b, Whh_b, bih_b, bhh_b):
    B, T = words.shape
    D_word = word_table.shape[1]                            # 100
    LANES = 128

    # (1) word embedding lookup (gather — glue)
    x_word = word_table[words]                              # [B, T, 100]

    # (2) linear(bert_outs) + word embedding, tiled fused Pallas matmul kernel
    Bb, Tb, Db = bert_outs.shape
    M = Bb * Tb
    w_pad = jnp.pad(lin_w, ((0, LANES - D_word), (0, 0)))   # [128, 768]
    w_t = w_pad.T.astype(jnp.bfloat16)                      # [768, 128] bf16
    b_pad = jnp.pad(lin_b, (0, LANES - D_word)).reshape(1, LANES)
    wemb_flat = x_word[:, :Tb, :].reshape(M, D_word)        # NOT lane-padded in HBM
    fused = linear_add(bert_outs.reshape(M, Db).astype(jnp.bfloat16),
                       w_t, b_pad, wemb_flat)
    x_embed = fused[:, :D_word].reshape(Bb, Tb, D_word)
    if Tb < T:   # torch pads x_ext_word_embed with zeros, then adds word emb
        x_embed = jnp.concatenate([x_embed, x_word[:, Tb:, :]], axis=1)

    # (3) CharLSTM: time-major bf16 char embedding gather (glue), merged BiLSTM kernel
    ce_t = char_table.astype(jnp.bfloat16)[char_idxs.T]     # [L, N, 200] bf16, time-major
    wx, wh, bb = _merge_bilstm_params(Wih_f, Whh_f, bih_f, bhh_f,
                                      Wih_b, Whh_b, bih_b, bhh_b)
    char_out = char_bilstm(ce_t, word_lens.astype(jnp.int32).reshape(-1, 1),
                           wx, wh, bb)                      # [N, 2H]
    x_char = char_out.reshape(B, T, -1)                     # [B, T, 2H]

    # (4) concat along feature dim
    return jnp.concatenate([x_embed, x_char], axis=2)


# ----------------------------------------------------------------------------
# Pure-JAX reference (same math, f32) for a correctness check
# ----------------------------------------------------------------------------
def ref_forward(words, bert_outs, char_idxs, word_lens,
                word_table, char_table, lin_w, lin_b,
                Wih_f, Whh_f, bih_f, bhh_f, Wih_b, Whh_b, bih_b, bhh_b):
    B, T = words.shape
    x_word = word_table[words]
    x_ext = bert_outs @ lin_w.T + lin_b
    x_embed = x_word + x_ext
    ce = char_table[char_idxs]                              # [N, L, 200]
    N, L, _ = ce.shape
    H = Whh_f.shape[1]

    def run(reverse, Wih, Whh, b):
        h = jnp.zeros((N, H), jnp.float32)
        c = jnp.zeros((N, H), jnp.float32)
        ts = range(L - 1, -1, -1) if reverse else range(L)
        for t in ts:
            x_t = ce[:, t, :]
            gates = x_t @ Wih.T + h @ Whh.T + b
            i_g = jax.nn.sigmoid(gates[:, :H])
            f_g = jax.nn.sigmoid(gates[:, H:2 * H])
            g_g = jnp.tanh(gates[:, 2 * H:3 * H])
            o_g = jax.nn.sigmoid(gates[:, 3 * H:])
            c_new = f_g * c + i_g * g_g
            h_new = o_g * jnp.tanh(c_new)
            m = (t < word_lens)[:, None]
            h = jnp.where(m, h_new, h)
            c = jnp.where(m, c_new, c)
        return h

    h_f = run(False, Wih_f, Whh_f, bih_f + bhh_f)
    h_b = run(True, Wih_b, Whh_b, bih_b + bhh_b)
    x_char = jnp.concatenate([h_f, h_b], axis=1).reshape(B, T, -1)
    return jnp.concatenate([x_embed, x_char], axis=2)


if __name__ == "__main__":
    # small shapes consistent with the module
    B, T = 2, 8                  # batch, sentence length
    WORD_VOCAB, CHAR_VOCAB = 50, 40
    WORD_EMB = 100               # conf.word_emb_dim == linear hidden_size (100)
    BERT_DIM = 768               # fixed by the module
    CHAR_DIM = 200               # fixed by CharLSTM(char_dict_size, 200, ...)
    TAG_EMB = 64                 # conf.tag_emb_dim
    H = TAG_EMB // 2             # char LSTM hidden
    L = 8                        # max chars per word
    N = B * T

    key = jax.random.PRNGKey(0)
    ks = jax.random.split(key, 16)

    # deterministic parameter init (shapes from __init__; values synthetic)
    word_table = (0.1 * jax.random.normal(ks[0], (WORD_VOCAB, WORD_EMB), jnp.float32)
                  ).at[0].set(0.0)                                  # padding_idx = 0
    char_table = (0.1 * jax.random.normal(ks[1], (CHAR_VOCAB, CHAR_DIM), jnp.float32)
                  ).at[0].set(0.0)
    q, _ = jnp.linalg.qr(jax.random.normal(ks[2], (BERT_DIM, WORD_EMB), jnp.float32))
    lin_w = q.T                                                     # orthonormal [100, 768]
    lin_b = jnp.zeros((WORD_EMB,), jnp.float32)

    scale = 1.0 / (H ** 0.5)
    def u(k, shape):
        return jax.random.uniform(k, shape, jnp.float32, -scale, scale)
    Wih_f = u(ks[3], (4 * H, CHAR_DIM)); Whh_f = u(ks[4], (4 * H, H))
    bih_f = u(ks[5], (4 * H,));          bhh_f = u(ks[6], (4 * H,))
    Wih_b = u(ks[7], (4 * H, CHAR_DIM)); Whh_b = u(ks[8], (4 * H, H))
    bih_b = u(ks[9], (4 * H,));          bhh_b = u(ks[10], (4 * H,))

    # deterministic example inputs
    words = jax.random.randint(ks[11], (B, T), 1, WORD_VOCAB, jnp.int32)
    bert_outs = jax.random.normal(ks[12], (B, T, BERT_DIM), jnp.float32)
    word_lens = jax.random.randint(ks[13], (N,), 1, L + 1, jnp.int32)
    char_idxs = jax.random.randint(ks[14], (N, L), 1, CHAR_VOCAB, jnp.int32)
    char_idxs = jnp.where(jnp.arange(L)[None, :] < word_lens[:, None], char_idxs, 0)

    args = (words, bert_outs, char_idxs, word_lens,
            word_table, char_table, lin_w, lin_b,
            Wih_f, Whh_f, bih_f, bhh_f, Wih_b, Whh_b, bih_b, bhh_b)

    x_final = jax.block_until_ready(input_layer_forward(*args))
    assert x_final.shape == (B, T, WORD_EMB + TAG_EMB), x_final.shape

    x_ref = jax.block_until_ready(ref_forward(*args))
    # tolerance loosened for the bf16 bert matmul / bf16 char-emb projection (f32 accumulate)
    assert jnp.allclose(x_final, x_ref, rtol=2e-2, atol=2e-2), \
        float(jnp.max(jnp.abs(x_final - x_ref)))

    print("KERNEL_OK")
</pallas_src>

<mosaic_0001>
module attributes {stable_mosaic.version = 11 : i64} {
  func.func @linear_add_kernel(%arg0: i32, %arg1: memref<256x768xbf16, #tpu.memory_space<vmem>>, %arg2: memref<768x128xbf16, #tpu.memory_space<vmem>>, %arg3: memref<1x128xf32, #tpu.memory_space<vmem>>, %arg4: memref<256x100xf32, #tpu.memory_space<vmem>>, %arg5: memref<256x128xf32, #tpu.memory_space<vmem>>) attributes {dimension_semantics = [#tpu.dimension_semantics<parallel>], iteration_bounds = array<i64: 1>, scalar_prefetch = 0 : i64, scratch_operands = 0 : i64, tpu.core_type = #tpu.core_type<tc>, window_params = [{transform_indices = @transform_0, window_bounds = array<i64: 256, 768>}, {pipeline_mode = #tpu.pipeline_mode<synchronous>, transform_indices = @transform_1, window_bounds = array<i64: 768, 128>}, {pipeline_mode = #tpu.pipeline_mode<synchronous>, transform_indices = @transform_2, window_bounds = array<i64: 1, 128>}, {transform_indices = @transform_3, window_bounds = array<i64: 256, 100>}, {transform_indices = @transform_4, window_bounds = array<i64: 256, 128>}]} {
    %c0 = arith.constant 0 : index
    %c0_0 = arith.constant 0 : index
    %0 = vector.load %arg1[%c0, %c0_0] : memref<256x768xbf16, #tpu.memory_space<vmem>>, vector<256x768xbf16>
    %c0_1 = arith.constant 0 : index
    %c0_2 = arith.constant 0 : index
    %1 = vector.load %arg2[%c0_1, %c0_2] : memref<768x128xbf16, #tpu.memory_space<vmem>>, vector<768x128xbf16>
    %cst = arith.constant dense<0.000000e+00> : vector<256x128xf32>
    %2 = tpu.matmul %0, %1, %cst {dimension_numbers = #tpu.dot_dimension_numbers<[1], [0], [0], [1], [0, 0, 1, 1], [], []>} : vector<256x768xbf16>, vector<768x128xbf16>, vector<256x128xf32> -> vector<256x128xf32>
    %c0_3 = arith.constant 0 : index
    %c0_4 = arith.constant 0 : index
    %3 = vector.load %arg4[%c0_3, %c0_4] : memref<256x100xf32, #tpu.memory_space<vmem>>, vector<256x100xf32>
    %cst_5 = arith.constant 0.000000e+00 : f32
    %4 = vector.broadcast %cst_5 : f32 to vector<256x28xf32>
    %5 = tpu.concatenate %3, %4 in 1 : vector<256x100xf32>, vector<256x28xf32> -> vector<256x128xf32>
    %c0_6 = arith.constant 0 : index
    %c0_7 = arith.constant 0 : index
    %6 = vector.load %arg3[%c0_6, %c0_7] : memref<1x128xf32, #tpu.memory_space<vmem>>, vector<1x128xf32>
    %7 = vector.broadcast %6 : vector<1x128xf32> to vector<256x128xf32>
    %8 = arith.addf %2, %7 : vector<256x128xf32>
    %9 = arith.addf %8, %5 : vector<256x128xf32>
    %c0_8 = arith.constant 0 : index
    %c0_9 = arith.constant 0 : index
    %10 = vector.load %arg5[%c0_8, %c0_9] : memref<256x128xf32, #tpu.memory_space<vmem>>, vector<256x128xf32>
    tpu.vector_store %arg5[%c0_8, %c0_9], %9 {strides = array<i32>} : memref<256x128xf32, #tpu.memory_space<vmem>>, vector<256x128xf32>,
    return
  }
  func.func @transform_0(%arg0: i32) -> (i32, i32) {
    %c0_i32 = arith.constant 0 : i32
    %c0_i32_0 = arith.constant 0 : i32
    return %arg0, %c0_i32 : i32, i32
  }
  func.func @transform_1(%arg0: i32) -> (i32, i32) {
    %c0_i32 = arith.constant 0 : i32
    %c0_i32_0 = arith.constant 0 : i32
    %c0_i32_1 = arith.constant 0 : i32
    return %c0_i32, %c0_i32_0 : i32, i32
  }
  func.func @transform_2(%arg0: i32) -> (i32, i32) {
    %c0_i32 = arith.constant 0 : i32
    %c0_i32_0 = arith.constant 0 : i32
    %c0_i32_1 = arith.constant 0 : i32
    return %c0_i32, %c0_i32_0 : i32, i32
  }
  func.func @transform_3(%arg0: i32) -> (i32, i32) {
    %c0_i32 = arith.constant 0 : i32
    %c0_i32_0 = arith.constant 0 : i32
    return %arg0, %c0_i32 : i32, i32
  }
  func.func @transform_4(%arg0: i32) -> (i32, i32) {
    %c0_i32 = arith.constant 0 : i32
    %c0_i32_0 = arith.constant 0 : i32
    return %arg0, %c0_i32 : i32, i32
  }
}

</mosaic_0001>

<bundles_post_ra>
// kernel: tpu_custom_call.1
= control target key start
LH: loop header
LB: loop body
LE: loop exit
PB: predicated region body
PF: predicated region fallthrough
CT: control target
= control target key end

     0   :  { %9 = vsyncpa [#allocation3], 0  ;;  %s2832_s0 = inlined_call_operand.hbm [shape: bf16[256,768], index: 0, kind: input, shape index: {}]   ;;  %s2833_s1 = inlined_call_operand.vmem [shape: bf16[768,128], index: 1, kind: input, shape index: {}]   ;;  %s2834_s2 = inlined_call_operand.vmem [shape: f32[1,128], index: 2, kind: input, shape index: {}]   ;;  %s2835_s3 = inlined_call_operand.vmem [shape: f32[256,100], index: 3, kind: input, shape index: {}]   ;;  %s2836_s4 = inlined_call_operand.hbm [shape: f32[256,128], index: 4, kind: output, shape index: {}]  }
   0x1   :  { %10 = vsyncpa [#allocation4], 0  ;;  %s2372_s15 = smov [#allocation2]   ;;  %s2324_s19 = scalar_lea.hbm %s2832_s0, 12288 }
   0x2   :  { %s16_s16 = sshll.u32 %s2372_s15, 4  ;;  %p2325_p0 = scmp.ne.s32.totalorder %s2832_s0, %s2324_s19  ;;  %s17_s16 = int_to_ptr.vmem [resolvable:$true] %s16_s16 }
   0x3   :  { %p2328_p1 = scmp.lt.u32.totalorder %s2324_s19, %s2832_s0 }
   0x5   :  { %p2330_p2 = pnand %p2328_p1, %p2325_p0 }
   0x7   :  { %2333 = shalt.err (!%p2330_p2)
}
   0x8   :  { %s2334_s24 = scalar_lea.vmem %s17_s16, 12288  ;;  %p2339_p4 = scmp.lt.s32.totalorder %s17_s16, %s17_s16 }
   0x9   :  { %p2335_p3 = scmp.ne.s32.totalorder %s17_s16, %s2334_s24  ;;  %p2340_p5 = scmp.lt.s32.totalorder %s2334_s24, %s2334_s24 }
   0xb   :  { %p2341_p6 = por %p2340_p5, %p2339_p4 }
   0xd   :  { %p2342_p7 = pnand %p2341_p6, %p2335_p3 }
   0xf   :  { %2345 = shalt.err (!%p2342_p7)
}
  0x10   :  { %s2373_s25 = smov 384   ;;  %s2374_s26 = smov 24  }
  0x11   :  { %22 = dma.hbm_to_vmem [thread:$0]  %s2832_s0, 12288, %s17_s16, [#allocation3], %s2373_s25, %s2373_s25, %s2374_s26  }
  0x12   :  { %2368 = dma.done.wait [#allocation3], 12288  }
  0x13   :  { %2369 = vsyncadd [#allocation3], 4294955008  ;;  %v2132_v0 = vld [vmem:[%s2833_s1 + $0x40] sm:$0xff]   ;;  %v2134_v2 = vld [vmem:[%s2833_s1 + $0x48] sm:$0xff]   ;;  %vm257_vm0 = vcmask 818176   ;;  %s2375_s23 = smov [#allocation5]  }
  0x14   :  { %v2133_v1 = vld [vmem:[%s2833_s1] sm:$0xff]   ;;  %1774 = vmatprep.subr.bf16.mxu0 %v2132_v0  ;;  %2110 = vmatprep.subr.bf16.mxu1 %v2132_v0  ;;  %v2135_v3 = vld [vmem:[%s2833_s1 + $0x8] sm:$0xff]   ;;  %v2136_v4 = vld [vmem:[%s2833_s1 + $0x50] sm:$0xff]   ;;  %s1617_s24 = sshll.u32 %s2375_s23, 4  ;;  %s1618_s24 = int_to_ptr.vmem [resolvable:$true] %s1617_s24 }
  0x15   :  { %1775 = vmatpush3.bf16.msra.mxu0 %v2133_v1  ;;  %2118 = vmatpush3.bf16.msra.mxu1 %v2133_v1  ;;  %v2137_v5 = vld [vmem:[%s2833_s1 + $0x10] sm:$0xff]   ;;  %v2138_v6 = vld [vmem:[%s2833_s1 + $0x58] sm:$0xff]   ;;  %v2140_v8 = vld [vmem:[%s2833_s1 + $0x60] sm:$0xff]   ;;  %s2346_s25 = scalar_lea.vmem %s1618_s24, 4096  ;;  %p2351_p9 = scmp.lt.s32.totalorder %s1618_s24, %s1618_s24 }
  0x16   :  { %1776 = vmatprep.subr.bf16.mxu0 %v2134_v2  ;;  %2111 = vmatprep.subr.bf16.mxu1 %v2134_v2  ;;  %v2139_v7 = vld [vmem:[%s2833_s1 + $0x18] sm:$0xff]   ;;  %v2141_v9 = vld [vmem:[%s2833_s1 + $0x20] sm:$0xff]   ;;  %v2142_v10 = vld [vmem:[%s2833_s1 + $0x68] sm:$0xff]   ;;  %p2347_p8 = scmp.ne.s32.totalorder %s1618_s24, %s2346_s25  ;;  %p2352_p10 = scmp.lt.s32.totalorder %s2346_s25, %s2346_s25 }
  0x17   :  { %v2150_v11 = vld [vmem:[#allocation2 + $0x4] ss:$24 sps:$4 sm:$0xff]   ;;  %v2143_v13 = vld [vmem:[%s2833_s1 + $0x28] sm:$0xff]   ;;  %v2144_v14 = vld [vmem:[%s2833_s1 + $0x70] sm:$0xff]  }
  0x18   :  { %v2153_v12 = vld [vmem:[#allocation2 + $0x184] ss:$24 sps:$4 sm:$0xff]   ;;  %1097 = vmatprep.mubr.bf16.mxu0 %v2150_v11  ;;  %v2145_v15 = vld [vmem:[%s2833_s1 + $0x30] sm:$0xff]   ;;  %v2148_v19 = vld [vmem:[#allocation2] ss:$24 sps:$4 sm:$0xff]   ;;  %p2353_p11 = por %p2352_p10, %p2351_p9 }
  0x19   :  { %1777 = vmatpush3.bf16.msra.mxu0 %v2135_v3  ;;  %2119 = vmatpush3.bf16.msra.mxu1 %v2135_v3  ;;  %v2146_v16 = vld [vmem:[%s2833_s1 + $0x78] sm:$0xff]   ;;  %v2154_v18 = vld [vmem:[%s2833_s1 + $0xc0] sm:$0xff]   ;;  %v2158_v24 = vld [vmem:[#allocation2 + $0x34] ss:$24 sps:$4 sm:$0xff]  }
  0x1a   :  { %1778 = vmatprep.subr.bf16.mxu0 %v2136_v4  ;;  %2112 = vmatprep.subr.bf16.mxu1 %v2136_v4  ;;  %v2147_v17 = vld [vmem:[%s2833_s1 + $0x38] sm:$0xff]   ;;  %v2156_v20 = vld [vmem:[%s2833_s1 + $0x140] sm:$0xff]   ;;  %v2160_v25 = vld [vmem:[#allocation2 + $0x1b4] ss:$24 sps:$4 sm:$0xff]   ;;  %p2354_p12 = pnand %p2353_p11, %p2347_p8 }
  0x1b   :  { %1161 = vmatprep.mubr.bf16.mxu1 %v2153_v12  ;;  %v2151_v21 = vld [vmem:[#allocation2 + $0x180] ss:$24 sps:$4 sm:$0xff]   ;;  %v2164_v26 = vld [vmem:[%s2833_s1 + $0xc8] sm:$0xff]   ;;  %v2174_v30 = vld [vmem:[%s2833_s1 + $0xd0] sm:$0xff]  }
  0x1c   :  { %v2155_v22 = vld [vmem:[%s2833_s1 + $0x80] sm:$0xff]   ;;  %v2165_v27 = vld [vmem:[%s2833_s1 + $0x88] sm:$0xff]   ;;  %v2176_v33 = vld [vmem:[%s2833_s1 + $0x150] sm:$0xff]  }
  0x1d   :  { %1779 = vmatpush3.bf16.msra.mxu0 %v2137_v5  ;;  %2120 = vmatpush3.bf16.msra.mxu1 %v2137_v5  ;;  %v2157_v23 = vld [vmem:[%s2833_s1 + $0x100] sm:$0xff]   ;;  %v2166_v28 = vld [vmem:[%s2833_s1 + $0x148] sm:$0xff]   ;;  %v2175_v36 = vld [vmem:[%s2833_s1 + $0x90] sm:$0xff]  }
  0x1e   :  { %1780 = vmatprep.subr.bf16.mxu0 %v2138_v6  ;;  %2113 = vmatprep.subr.bf16.mxu1 %v2138_v6  ;;  %v2167_v29 = vld [vmem:[%s2833_s1 + $0x108] sm:$0xff]   ;;  %v2168_v34 = vld [vmem:[#allocation2 + $0x64] ss:$24 sps:$4 sm:$0xff]   ;;  %v2177_v37 = vld [vmem:[%s2833_s1 + $0x110] sm:$0xff]  }
  0x1f   :  { %v2162_v31 = vld [vmem:[#allocation2 + $0x30] ss:$24 sps:$4 sm:$0xff]   ;;  %v2170_v35 = vld [vmem:[#allocation2 + $0x1e4] ss:$24 sps:$4 sm:$0xff]   ;;  %v2172_v40 = vld [vmem:[#allocation2 + $0x60] ss:$24 sps:$4 sm:$0xff]  }
  0x20   :  { %v2163_v32 = vld [vmem:[#allocation2 + $0x1b0] ss:$24 sps:$4 sm:$0xff]   ;;  %v2184_v38 = vld [vmem:[%s2833_s1 + $0xd8] sm:$0xff]   ;;  %v2178_v44 = vld [vmem:[#allocation2 + $0x94] ss:$24 sps:$4 sm:$0xff]  }
  0x21   :  { %1781 = vmatpush3.bf16.msra.mxu0 %v2139_v7  ;;  %2121 = vmatpush3.bf16.msra.mxu1 %v2139_v7  ;;  %v2186_v39 = vld [vmem:[%s2833_s1 + $0x158] sm:$0xff]   ;;  %v2180_v45 = vld [vmem:[#allocation2 + $0x214] ss:$24 sps:$4 sm:$0xff]   ;;  %v2194_v46 = vld [vmem:[%s2833_s1 + $0xe0] sm:$0xff]  }
  0x22   :  { %1782 = vmatprep.subr.bf16.mxu0 %v2140_v8  ;;  %2114 = vmatprep.subr.bf16.mxu1 %v2140_v8  ;;  %v2173_v41 = vld [vmem:[#allocation2 + $0x1e0] ss:$24 sps:$4 sm:$0xff]   ;;  %v2182_v50 = vld [vmem:[#allocation2 + $0x90] ss:$24 sps:$4 sm:$0xff]   ;;  %v2188_v53 = vld [vmem:[#allocation2 + $0xc4] ss:$24 sps:$4 sm:$0xff]  }
  0x23   :  { %v2185_v42 = vld [vmem:[%s2833_s1 + $0x98] sm:$0xff]   ;;  %v2195_v47 = vld [vmem:[%s2833_s1 + $0xa0] sm:$0xff]   ;;  %v2183_v51 = vld [vmem:[#allocation2 + $0x210] ss:$24 sps:$4 sm:$0xff]  }
  0x24   :  { %v2187_v43 = vld [vmem:[%s2833_s1 + $0x118] sm:$0xff]   ;;  %v2196_v48 = vld [vmem:[%s2833_s1 + $0x160] sm:$0xff]   ;;  %v2204_v52 = vld [vmem:[%s2833_s1 + $0xe8] sm:$0xff]  }
  0x25   :  { %1783 = vmatpush3.bf16.msra.mxu0 %v2141_v9  ;;  %2122 = vmatpush3.bf16.msra.mxu1 %v2141_v9  ;;  %v2197_v49 = vld [vmem:[%s2833_s1 + $0x120] sm:$0xff]   ;;  %v2205_v55 = vld [vmem:[%s2833_s1 + $0xa8] sm:$0xff]   ;;  %v2214_v58 = vld [vmem:[%s2833_s1 + $0xf0] sm:$0xff]  }
  0x26   :  { %1784 = vmatprep.subr.bf16.mxu0 %v2142_v10  ;;  %2115 = vmatprep.subr.bf16.mxu1 %v2142_v10  ;;  %v2190_v54 = vld [vmem:[#allocation2 + $0x244] ss:$24 sps:$4 sm:$0xff]   ;;  %v2206_v56 = vld [vmem:[%s2833_s1 + $0x168] sm:$0xff]   ;;  %v2192_v59 = vld [vmem:[#allocation2 + $0xc0] ss:$24 sps:$4 sm:$0xff]  }
  0x27   :  { %v2207_v57 = vld [vmem:[%s2833_s1 + $0x128] sm:$0xff]   ;;  %v2193_v60 = vld [vmem:[#allocation2 + $0x240] ss:$24 sps:$4 sm:$0xff]   ;;  %v2215_v61 = vld [vmem:[%s2833_s1 + $0xb0] sm:$0xff]  }
  0x28   :  { %v2198_v62 = vld [vmem:[#allocation2 + $0xf4] ss:$24 sps:$4 sm:$0xff]   ;;  %v2224_v2 = vld [vmem:[%s2833_s1 + $0xf8] sm:$0xff]   ;;  %v2202_v6 = vld [vmem:[#allocation2 + $0xf0] ss:$24 sps:$4 sm:$0xff]  }
  0x29   :  { %1785 = vmatpush3.bf16.msra.mxu0 %v2143_v13  ;;  %2123 = vmatpush3.bf16.msra.mxu1 %v2143_v13  ;;  %v2216_v63 = vld [vmem:[%s2833_s1 + $0x170] sm:$0xff]   ;;  %v2225_v3 = vld [vmem:[%s2833_s1 + $0xb8] sm:$0xff]  }
  0x2a   :  { %1786 = vmatprep.subr.bf16.mxu0 %v2144_v14  ;;  %2116 = vmatprep.subr.bf16.mxu1 %v2144_v14  ;;  %v2217_v0 = vld [vmem:[%s2833_s1 + $0x130] sm:$0xff]   ;;  %v2226_v4 = vld [vmem:[%s2833_s1 + $0x178] sm:$0xff]  }
  0x2b   :  { %v2200_v1 = vld [vmem:[#allocation2 + $0x274] ss:$24 sps:$4 sm:$0xff]   ;;  %v2227_v5 = vld [vmem:[%s2833_s1 + $0x138] sm:$0xff]   ;;  %v2203_v7 = vld [vmem:[#allocation2 + $0x270] ss:$24 sps:$4 sm:$0xff]  }
  0x2c   :  { %v2208_v8 = vld [vmem:[#allocation2 + $0x124] ss:$24 sps:$4 sm:$0xff]   ;;  %v2212_v10 = vld [vmem:[#allocation2 + $0x120] ss:$24 sps:$4 sm:$0xff]   ;;  %v2218_v12 = vld [vmem:[#allocation2 + $0x154] ss:$24 sps:$4 sm:$0xff]  }
  0x2d   :  { %1787 = vmatpush3.bf16.msra.mxu0 %v2145_v15  ;;  %2124 = vmatpush3.bf16.msra.mxu1 %v2145_v15  ;;  %v2210_v9 = vld [vmem:[#allocation2 + $0x2a4] ss:$24 sps:$4 sm:$0xff]   ;;  %v2213_v11 = vld [vmem:[#allocation2 + $0x2a0] ss:$24 sps:$4 sm:$0xff]   ;;  %v2220_v13 = vld [vmem:[#allocation2 + $0x2d4] ss:$24 sps:$4 sm:$0xff]  }
  0x2e   :  { %1788 = vmatprep.subr.bf16.mxu0 %v2146_v16  ;;  %2117 = vmatprep.subr.bf16.mxu1 %v2146_v16  ;;  %v2222_v14 = vld [vmem:[#allocation2 + $0x150] ss:$24 sps:$4 sm:$0xff]   ;;  %v2230_v16 = vld [vmem:[#allocation2 + $0xc] ss:$24 sps:$4 sm:$0xff]  }
  0x2f   :  { %v2223_v15 = vld [vmem:[#allocation2 + $0x2d0] ss:$24 sps:$4 sm:$0xff]  }
  0x31   :  { %1789 = vmatpush3.bf16.msra.mxu0 %v2147_v17  ;;  %2125 = vmatpush3.bf16.msra.mxu1 %v2147_v17  ;;  %v2233_v17 = vld [vmem:[#allocation2 + $0x14] ss:$24 sps:$4 sm:$0xff]  }
  0x32   :  { %1886 = vmatprep.subr.bf16.mxu1 %v2154_v18  ;;  %1998 = vmatprep.subr.bf16.mxu0 %v2156_v20  ;;  %v2228_v18 = vld [vmem:[#allocation2 + $0x8] ss:$24 sps:$4 sm:$0xff]   ;;  %v2234_v20 = vld [vmem:[#allocation2 + $0x3c] ss:$24 sps:$4 sm:$0xff]  }
  0x34   :  { %1098 = vmatmul.mubr.bf16.vlgmr.msra.gmra.mrb[0].mxu0 %v2148_v19  ;;  %1162 = vmatmul.mubr.bf16.vlgmr.msra.gmra.mrb[0].mxu1 %v2151_v21  ;;  %v2231_v19 = vld [vmem:[#allocation2 + $0x10] ss:$24 sps:$4 sm:$0xff]   ;;  %v2236_v21 = vld [vmem:[#allocation2 + $0x44] ss:$24 sps:$4 sm:$0xff]  }
  0x35   :  { %1887 = vmatpush3.bf16.msra.mxu1 %v2155_v22  ;;  %1999 = vmatpush3.bf16.msra.mxu0 %v2157_v23  ;;  %v2238_v22 = vld [vmem:[#allocation2 + $0x38] ss:$24 sps:$4 sm:$0xff]  }
  0x36   :  { %1105 = vmatprep.mubr.bf16.mxu0 %v2158_v24  ;;  %1169 = vmatprep.mubr.bf16.mxu1 %v2160_v25  ;;  %v2239_v23 = vld [vmem:[#allocation2 + $0x40] ss:$24 sps:$4 sm:$0xff]   ;;  %v2240_v24 = vld [vmem:[#allocation2 + $0x6c] ss:$24 sps:$4 sm:$0xff]  }
  0x37   :  { %1888 = vmatprep.subr.bf16.mxu1 %v2164_v26  ;;  %2000 = vmatprep.subr.bf16.mxu0 %v2166_v28  ;;  %v2242_v25 = vld [vmem:[#allocation2 + $0x74] ss:$24 sps:$4 sm:$0xff]   ;;  %v2244_v26 = vld [vmem:[#allocation2 + $0x68] ss:$24 sps:$4 sm:$0xff]  }
  0x38   :  { %v2246_v28 = vld [vmem:[#allocation2 + $0x9c] ss:$24 sps:$4 sm:$0xff]  }
  0x39   :  { %1889 = vmatpush3.bf16.msra.mxu1 %v2165_v27  ;;  %2001 = vmatpush3.bf16.msra.mxu0 %v2167_v29  ;;  %v2245_v27 = vld [vmem:[#allocation2 + $0x70] ss:$24 sps:$4 sm:$0xff]   ;;  %v2248_v29 = vld [vmem:[#allocation2 + $0xa4] ss:$24 sps:$4 sm:$0xff]  }
  0x3a   :  { %1890 = vmatprep.subr.bf16.mxu1 %v2174_v30  ;;  %2002 = vmatprep.subr.bf16.mxu0 %v2176_v33  ;;  %v2250_v30 = vld [vmem:[#allocation2 + $0x98] ss:$24 sps:$4 sm:$0xff]   ;;  %v2254_v33 = vld [vmem:[#allocation2 + $0xd4] ss:$24 sps:$4 sm:$0xff]  }
  0x3c   :  { %1106 = vmatmul.mubr.bf16.gmra.mrb[4].mxu0 %v2162_v31  ;;  %1170 = vmatmul.mubr.bf16.gmra.mrb[4].mxu1 %v2163_v32  ;;  %v2251_v31 = vld [vmem:[#allocation2 + $0xa0] ss:$24 sps:$4 sm:$0xff]   ;;  %v2252_v32 = vld [vmem:[#allocation2 + $0xcc] ss:$24 sps:$4 sm:$0xff]  }
  0x3d   :  { %1113 = vmatprep.mubr.bf16.mxu0 %v2168_v34  ;;  %1177 = vmatprep.mubr.bf16.mxu1 %v2170_v35  ;;  %v2256_v34 = vld [vmem:[#allocation2 + $0xc8] ss:$24 sps:$4 sm:$0xff]  }
  0x3e   :  { %1891 = vmatpush3.bf16.msra.mxu1 %v2175_v36  ;;  %2003 = vmatpush3.bf16.msra.mxu0 %v2177_v37  ;;  %v2257_v35 = vld [vmem:[#allocation2 + $0xd0] ss:$24 sps:$4 sm:$0xff]   ;;  %v2258_v36 = vld [vmem:[#allocation2 + $0xfc] ss:$24 sps:$4 sm:$0xff]  }
  0x3f   :  { %1892 = vmatprep.subr.bf16.mxu1 %v2184_v38  ;;  %2004 = vmatprep.subr.bf16.mxu0 %v2186_v39  ;;  %v2260_v37 = vld [vmem:[#allocation2 + $0x104] ss:$24 sps:$4 sm:$0xff]   ;;  %v2262_v38 = vld [vmem:[#allocation2 + $0xf8] ss:$24 sps:$4 sm:$0xff]  }
  0x40   :  { %v2263_v39 = vld [vmem:[#allocation2 + $0x100] ss:$24 sps:$4 sm:$0xff]  }
  0x42   :  { %1893 = vmatpush3.bf16.msra.mxu1 %v2185_v42  ;;  %2005 = vmatpush3.bf16.msra.mxu0 %v2187_v43  ;;  %v2268_v42 = vld [vmem:[#allocation2 + $0x128] ss:$24 sps:$4 sm:$0xff]  }
  0x43   :  { %1894 = vmatprep.subr.bf16.mxu1 %v2194_v46  ;;  %2006 = vmatprep.subr.bf16.mxu0 %v2196_v48  ;;  %v2269_v43 = vld [vmem:[#allocation2 + $0x130] ss:$24 sps:$4 sm:$0xff]   ;;  %v2276_v48 = vld [vmem:[#allocation2 + $0x18c] ss:$24 sps:$4 sm:$0xff]  }
  0x44   :  { %1114 = vmatmul.mubr.bf16.gmra.mrb[8].mxu0 %v2172_v40  ;;  %1178 = vmatmul.mubr.bf16.gmra.mrb[8].mxu1 %v2173_v41  ;;  %v2264_v40 = vld [vmem:[#allocation2 + $0x12c] ss:$24 sps:$4 sm:$0xff]   ;;  %v2274_v46 = vld [vmem:[#allocation2 + $0x158] ss:$24 sps:$4 sm:$0xff]  }
  0x45   :  { %1121 = vmatprep.mubr.bf16.mxu0 %v2178_v44  ;;  %1185 = vmatprep.mubr.bf16.mxu1 %v2180_v45  ;;  %v2266_v41 = vld [vmem:[#allocation2 + $0x134] ss:$24 sps:$4 sm:$0xff]   ;;  %v2272_v45 = vld [vmem:[#allocation2 + $0x164] ss:$24 sps:$4 sm:$0xff]  }
  0x46   :  { %1895 = vmatpush3.bf16.msra.mxu1 %v2195_v47  ;;  %2007 = vmatpush3.bf16.msra.mxu0 %v2197_v49  ;;  %v2270_v44 = vld [vmem:[#allocation2 + $0x15c] ss:$24 sps:$4 sm:$0xff]   ;;  %v2275_v47 = vld [vmem:[#allocation2 + $0x160] ss:$24 sps:$4 sm:$0xff]  }
  0x47   :  { %1896 = vmatprep.subr.bf16.mxu1 %v2204_v52  ;;  %2008 = vmatprep.subr.bf16.mxu0 %v2206_v56  ;;  %v2278_v49 = vld [vmem:[#allocation2 + $0x194] ss:$24 sps:$4 sm:$0xff]  }
  0x48   :  { %v2282_v52 = vld [vmem:[#allocation2 + $0x1bc] ss:$24 sps:$4 sm:$0xff]   ;;  %v2288_v56 = vld [vmem:[#allocation2 + $0x1ec] ss:$24 sps:$4 sm:$0xff]  }
  0x4a   :  { %1897 = vmatpush3.bf16.msra.mxu1 %v2205_v55  ;;  %2009 = vmatpush3.bf16.msra.mxu0 %v2207_v57  ;;  %v2287_v55 = vld [vmem:[#allocation2 + $0x1c0] ss:$24 sps:$4 sm:$0xff]   ;;  %v2290_v57 = vld [vmem:[#allocation2 + $0x1f4] ss:$24 sps:$4 sm:$0xff]  }
  0x4b   :  { %1898 = vmatprep.subr.bf16.mxu1 %v2214_v58  ;;  %2010 = vmatprep.subr.bf16.mxu0 %v2216_v63  ;;  %v2292_v58 = vld [vmem:[#allocation2 + $0x1e8] ss:$24 sps:$4 sm:$0xff]  }
  0x4c   :  { %1122 = vmatmul.mubr.bf16.gmra.mrb[12].mxu0 %v2182_v50  ;;  %1186 = vmatmul.mubr.bf16.gmra.mrb[12].mxu1 %v2183_v51  ;;  %v2280_v50 = vld [vmem:[#allocation2 + $0x188] ss:$24 sps:$4 sm:$0xff]  }
  0x4d   :  { %1129 = vmatprep.mubr.bf16.mxu0 %v2188_v53  ;;  %1193 = vmatprep.mubr.bf16.mxu1 %v2190_v54  ;;  %v2281_v51 = vld [vmem:[#allocation2 + $0x190] ss:$24 sps:$4 sm:$0xff]   ;;  %v2284_v53 = vld [vmem:[#allocation2 + $0x1c4] ss:$24 sps:$4 sm:$0xff]   ;;  %v2299_v63 = vld [vmem:[#allocation2 + $0x220] ss:$24 sps:$4 sm:$0xff]  }
  0x4e   :  { %1899 = vmatpush3.bf16.msra.mxu1 %v2215_v61  ;;  %2011 = vmatpush3.bf16.msra.mxu0 %v2217_v0  ;;  %v2286_v54 = vld [vmem:[#allocation2 + $0x1b8] ss:$24 sps:$4 sm:$0xff]   ;;  %v2296_v61 = vld [vmem:[#allocation2 + $0x224] ss:$24 sps:$4 sm:$0xff]  }
  0x4f   :  { %1900 = vmatprep.subr.bf16.mxu1 %v2224_v2  ;;  %2012 = vmatprep.subr.bf16.mxu0 %v2226_v4  ;;  %v2300_v0 = vld [vmem:[#allocation2 + $0x24c] ss:$24 sps:$4 sm:$0xff]   ;;  %v2304_v2 = vld [vmem:[#allocation2 + $0x248] ss:$24 sps:$4 sm:$0xff]   ;;  %v2306_v4 = vld [vmem:[#allocation2 + $0x27c] ss:$24 sps:$4 sm:$0xff]  }
  0x52   :  { %1901 = vmatpush3.bf16.msra.mxu1 %v2225_v3  ;;  %2013 = vmatpush3.bf16.msra.mxu0 %v2227_v5  ;;  %v2305_v3 = vld [vmem:[#allocation2 + $0x250] ss:$24 sps:$4 sm:$0xff]   ;;  %v2308_v5 = vld [vmem:[#allocation2 + $0x284] ss:$24 sps:$4 sm:$0xff]  }
  0x54   :  { %1130 = vmatmul.mubr.bf16.gmra.mrb[16].mxu0 %v2192_v59  ;;  %1194 = vmatmul.mubr.bf16.gmra.mrb[16].mxu1 %v2193_v60  ;;  %v2293_v59 = vld [vmem:[#allocation2 + $0x1f0] ss:$24 sps:$4 sm:$0xff]   ;;  %v2294_v60 = vld [vmem:[#allocation2 + $0x21c] ss:$24 sps:$4 sm:$0xff]  }
  0x55   :  { %1137 = vmatprep.mubr.bf16.mxu0 %v2198_v62  ;;  %1201 = vmatprep.mubr.bf16.mxu1 %v2200_v1  ;;  %v2298_v62 = vld [vmem:[#allocation2 + $0x218] ss:$24 sps:$4 sm:$0xff]   ;;  %v2302_v1 = vld [vmem:[#allocation2 + $0x254] ss:$24 sps:$4 sm:$0xff]  }
  0x5c   :  { %1138 = vmatmul.mubr.bf16.gmra.mrb[20].mxu0 %v2202_v6  ;;  %1202 = vmatmul.mubr.bf16.gmra.mrb[20].mxu1 %v2203_v7  ;;  %v2310_v6 = vld [vmem:[#allocation2 + $0x278] ss:$24 sps:$4 sm:$0xff]  }
  0x5d   :  { %1145 = vmatprep.mubr.bf16.mxu0 %v2208_v8  ;;  %1209 = vmatprep.mubr.bf16.mxu1 %v2210_v9  ;;  %v2311_v7 = vld [vmem:[#allocation2 + $0x280] ss:$24 sps:$4 sm:$0xff]   ;;  %v2312_v8 = vld [vmem:[#allocation2 + $0x2ac] ss:$24 sps:$4 sm:$0xff]  }
  0x5e   :  { %v2314_v9 = vld [vmem:[#allocation2 + $0x2b4] ss:$24 sps:$4 sm:$0xff]  }
  0x64   :  { %1146 = vmatmul.mubr.bf16.gmra.mrb[24].mxu0 %v2212_v10  ;;  %1210 = vmatmul.mubr.bf16.gmra.mrb[24].mxu1 %v2213_v11  ;;  %v2316_v10 = vld [vmem:[#allocation2 + $0x2a8] ss:$24 sps:$4 sm:$0xff]  }
  0x65   :  { %1153 = vmatprep.mubr.bf16.mxu0 %v2218_v12  ;;  %1217 = vmatprep.mubr.bf16.mxu1 %v2220_v13  ;;  %v2317_v11 = vld [vmem:[#allocation2 + $0x2b0] ss:$24 sps:$4 sm:$0xff]   ;;  %v2318_v12 = vld [vmem:[#allocation2 + $0x2dc] ss:$24 sps:$4 sm:$0xff]  }
  0x66   :  { %v2320_v13 = vld [vmem:[#allocation2 + $0x2e4] ss:$24 sps:$4 sm:$0xff]  }
  0x6c   :  { %1154 = vmatmul.mubr.bf16.gmra.mrb[28].mxu0 %v2222_v14  ;;  %1218 = vmatmul.mubr.bf16.gmra.mrb[28].mxu1 %v2223_v15  ;;  %v2322_v14 = vld [vmem:[#allocation2 + $0x2d8] ss:$24 sps:$4 sm:$0xff]  }
  0x6d   :  { %1258 = vmatprep.mubr.bf16.mxu1 %v2230_v16  ;;  %1419 = vmatprep.mubr.bf16.mxu0 %v2233_v17  ;;  %v2323_v15 = vld [vmem:[#allocation2 + $0x2e0] ss:$24 sps:$4 sm:$0xff]  }
  0x74   :  { %1259 = vmatmul.mubr.bf16.vlgmr.msra.gmra.mrb[32].mxu1 %v2228_v18  ;;  %1420 = vmatmul.mubr.bf16.vlgmr.msra.gmra.mrb[32].mxu0 %v2231_v19  ;;  %v2562_v18 = vld [vmem:[%s2834_s2] ss:$0 sm:$0xff] }
  0x75   :  { %1266 = vmatprep.mubr.bf16.mxu1 %v2234_v20  ;;  %1427 = vmatprep.mubr.bf16.mxu0 %v2236_v21 }
  0x7c   :  { %1267 = vmatmul.mubr.bf16.gmra.mrb[36].mxu1 %v2238_v22  ;;  %1428 = vmatmul.mubr.bf16.gmra.mrb[36].mxu0 %v2239_v23 }
  0x7d   :  { %1274 = vmatprep.mubr.bf16.mxu1 %v2240_v24  ;;  %1435 = vmatprep.mubr.bf16.mxu0 %v2242_v25 }
  0x84   :  { %1275 = vmatmul.mubr.bf16.gmra.mrb[40].mxu1 %v2244_v26  ;;  %1436 = vmatmul.mubr.bf16.gmra.mrb[40].mxu0 %v2245_v27 }
  0x85   :  { %1282 = vmatprep.mubr.bf16.mxu1 %v2246_v28  ;;  %1443 = vmatprep.mubr.bf16.mxu0 %v2248_v29 }
  0x8c   :  { %1283 = vmatmul.mubr.bf16.gmra.mrb[44].mxu1 %v2250_v30  ;;  %1444 = vmatmul.mubr.bf16.gmra.mrb[44].mxu0 %v2251_v31 }
  0x8d   :  { %1290 = vmatprep.mubr.bf16.mxu1 %v2252_v32  ;;  %1451 = vmatprep.mubr.bf16.mxu0 %v2254_v33 }
  0x94   :  { %1291 = vmatmul.mubr.bf16.gmra.mrb[48].mxu1 %v2256_v34  ;;  %1452 = vmatmul.mubr.bf16.gmra.mrb[48].mxu0 %v2257_v35 }
  0x95   :  { %1298 = vmatprep.mubr.bf16.mxu1 %v2258_v36  ;;  %1459 = vmatprep.mubr.bf16.mxu0 %v2260_v37 }
  0x9c   :  { %1299 = vmatmul.mubr.bf16.gmra.mrb[52].mxu1 %v2262_v38  ;;  %1460 = vmatmul.mubr.bf16.gmra.mrb[52].mxu0 %v2263_v39 }
  0x9d   :  { %1306 = vmatprep.mubr.bf16.mxu1 %v2264_v40  ;;  %1467 = vmatprep.mubr.bf16.mxu0 %v2266_v41 }
  0xa4   :  { %1307 = vmatmul.mubr.bf16.gmra.mrb[56].mxu1 %v2268_v42  ;;  %1468 = vmatmul.mubr.bf16.gmra.mrb[56].mxu0 %v2269_v43 }
  0xa5   :  { %1314 = vmatprep.mubr.bf16.mxu1 %v2270_v44  ;;  %1475 = vmatprep.mubr.bf16.mxu0 %v2272_v45 }
  0xac   :  { %1315 = vmatmul.mubr.bf16.gmra.mrb[60].mxu1 %v2274_v46  ;;  %1476 = vmatmul.mubr.bf16.gmra.mrb[60].mxu0 %v2275_v47 }
  0xad   :  { %1322 = vmatprep.mubr.bf16.mxu1 %v2276_v48  ;;  %1483 = vmatprep.mubr.bf16.mxu0 %v2278_v49 }
  0xb4   :  { %1323 = vmatmul.mubr.bf16.gmra.mrb[64].mxu1 %v2280_v50  ;;  %1484 = vmatmul.mubr.bf16.gmra.mrb[64].mxu0 %v2281_v51 }
  0xb5   :  { %1330 = vmatprep.mubr.bf16.mxu1 %v2282_v52  ;;  %1491 = vmatprep.mubr.bf16.mxu0 %v2284_v53 }
  0xbc   :  { %1331 = vmatmul.mubr.bf16.gmra.mrb[68].mxu1 %v2286_v54  ;;  %1492 = vmatmul.mubr.bf16.gmra.mrb[68].mxu0 %v2287_v55 }
  0xbd   :  { %1338 = vmatprep.mubr.bf16.mxu1 %v2288_v56  ;;  %1499 = vmatprep.mubr.bf16.mxu0 %v2290_v57 }
  0xc4   :  { %1339 = vmatmul.mubr.bf16.gmra.mrb[72].mxu1 %v2292_v58  ;;  %1500 = vmatmul.mubr.bf16.gmra.mrb[72].mxu0 %v2293_v59 }
  0xc5   :  { %1346 = vmatprep.mubr.bf16.mxu1 %v2294_v60  ;;  %1507 = vmatprep.mubr.bf16.mxu0 %v2296_v61 }
  0xcc   :  { %1347 = vmatmul.mubr.bf16.gmra.mrb[76].mxu1 %v2298_v62  ;;  %1508 = vmatmul.mubr.bf16.gmra.mrb[76].mxu0 %v2299_v63 }
  0xcd   :  { %1354 = vmatprep.mubr.bf16.mxu1 %v2300_v0  ;;  %1515 = vmatprep.mubr.bf16.mxu0 %v2302_v1 }
  0xd4   :  { %1355 = vmatmul.mubr.bf16.gmra.mrb[80].mxu1 %v2304_v2  ;;  %1516 = vmatmul.mubr.bf16.gmra.mrb[80].mxu0 %v2305_v3 }
  0xd5   :  { %1362 = vmatprep.mubr.bf16.mxu1 %v2306_v4  ;;  %1523 = vmatprep.mubr.bf16.mxu0 %v2308_v5 }
  0xdc   :  { %1363 = vmatmul.mubr.bf16.gmra.mrb[84].mxu1 %v2310_v6  ;;  %1524 = vmatmul.mubr.bf16.gmra.mrb[84].mxu0 %v2311_v7 }
  0xdd   :  { %1370 = vmatprep.mubr.bf16.mxu1 %v2312_v8  ;;  %1531 = vmatprep.mubr.bf16.mxu0 %v2314_v9 }
  0xe4   :  { %1371 = vmatmul.mubr.bf16.gmra.mrb[88].mxu1 %v2316_v10  ;;  %1532 = vmatmul.mubr.bf16.gmra.mrb[88].mxu0 %v2317_v11 }
  0xe5   :  { %1378 = vmatprep.mubr.bf16.mxu1 %v2318_v12  ;;  %1539 = vmatprep.mubr.bf16.mxu0 %v2320_v13 }
  0xec   :  { %1379 = vmatmul.mubr.bf16.gmra.mrb[92].mxu1 %v2322_v14  ;;  %1540 = vmatmul.mubr.bf16.gmra.mrb[92].mxu0 %v2323_v15 }
 0x107   :  { %v1790_v16 = vpop.f32.mrb[0].mxu0  ;;  %v1838_v17 = vpop.f32.mrb[0].mxu1 }
 0x108   :  { %v1791_v19 = vpop.f32.mrb[1].mxu0  ;;  %v1839_v20 = vpop.f32.mrb[1].mxu1 }
 0x109   :  { %v2564_v21 = vadd.f32 %v1791_v19, %v1790_v16  ;;  %v1840_v22 = vadd.f32 %v1839_v20, %v1838_v17  ;;  %v1793_v23 = vpop.f32.mrb[2].mxu0  ;;  %v1841_v24 = vpop.f32.mrb[2].mxu1 }
 0x10a   :  { %v1794_v25 = vpop.f32.mrb[3].mxu0  ;;  %v1842_v26 = vpop.f32.mrb[3].mxu1 }
 0x10b   :  { %v2567_v27 = vadd.f32 %v1840_v22, %v2562_v18  ;;  %v2569_v28 = vadd.f32 %v1794_v25, %v1793_v23  ;;  %v1843_v29 = vadd.f32 %v1842_v26, %v1841_v24 }
 0x10d   :  { %v2572_v30 = vadd.f32 %v1843_v29, %v2562_v18 }
 0x10f   :  { %v1796_v31 = vpop.f32.mrb[4].mxu0  ;;  %v1844_v32 = vpop.f32.mrb[4].mxu1 }
 0x110   :  { %v1797_v33 = vpop.f32.mrb[5].mxu0  ;;  %v1845_v34 = vpop.f32.mrb[5].mxu1 }
 0x111   :  { %v2574_v35 = vadd.f32 %v1797_v33, %v1796_v31  ;;  %v1846_v36 = vadd.f32 %v1845_v34, %v1844_v32  ;;  %v1799_v37 = vpop.f32.mrb[6].mxu0  ;;  %v1847_v38 = vpop.f32.mrb[6].mxu1 }
 0x112   :  { %v1800_v39 = vpop.f32.mrb[7].mxu0  ;;  %v1848_v40 = vpop.f32.mrb[7].mxu1 }
 0x113   :  { %v2577_v41 = vadd.f32 %v1846_v36, %v2562_v18  ;;  %v2579_v42 = vadd.f32 %v1800_v39, %v1799_v37  ;;  %v1849_v43 = vadd.f32 %v1848_v40, %v1847_v38 }
 0x115   :  { %v2582_v44 = vadd.f32 %v1849_v43, %v2562_v18 }
 0x117   :  { %v1802_v45 = vpop.f32.mrb[8].mxu0  ;;  %v1850_v46 = vpop.f32.mrb[8].mxu1 }
 0x118   :  { %v1803_v47 = vpop.f32.mrb[9].mxu0  ;;  %v1851_v48 = vpop.f32.mrb[9].mxu1 }
 0x119   :  { %v2584_v49 = vadd.f32 %v1803_v47, %v1802_v45  ;;  %v1852_v50 = vadd.f32 %v1851_v48, %v1850_v46  ;;  %v1805_v51 = vpop.f32.mrb[10].mxu0  ;;  %v1853_v52 = vpop.f32.mrb[10].mxu1 }
 0x11a   :  { %v1806_v53 = vpop.f32.mrb[11].mxu0  ;;  %v1854_v54 = vpop.f32.mrb[11].mxu1 }
 0x11b   :  { %v2587_v55 = vadd.f32 %v1852_v50, %v2562_v18  ;;  %v2589_v56 = vadd.f32 %v1806_v53, %v1805_v51  ;;  %v1855_v57 = vadd.f32 %v1854_v54, %v1853_v52 }
 0x11d   :  { %v2592_v58 = vadd.f32 %v1855_v57, %v2562_v18 }
 0x11f   :  { %v1808_v59 = vpop.f32.mrb[12].mxu0  ;;  %v1856_v60 = vpop.f32.mrb[12].mxu1 }
 0x120   :  { %v1809_v61 = vpop.f32.mrb[13].mxu0  ;;  %v1857_v62 = vpop.f32.mrb[13].mxu1 }
 0x121   :  { %v2594_v63 = vadd.f32 %v1809_v61, %v1808_v59  ;;  %v1858_v0 = vadd.f32 %v1857_v62, %v1856_v60  ;;  %v1811_v1 = vpop.f32.mrb[14].mxu0  ;;  %v1859_v2 = vpop.f32.mrb[14].mxu1 }
 0x122   :  { %v1812_v3 = vpop.f32.mrb[15].mxu0  ;;  %v1860_v4 = vpop.f32.mrb[15].mxu1 }
 0x123   :  { %v2597_v5 = vadd.f32 %v1858_v0, %v2562_v18  ;;  %v2599_v6 = vadd.f32 %v1812_v3, %v1811_v1  ;;  %v1861_v7 = vadd.f32 %v1860_v4, %v1859_v2 }
 0x125   :  { %v2602_v8 = vadd.f32 %v1861_v7, %v2562_v18 }
 0x127   :  { %v1814_v9 = vpop.f32.mrb[16].mxu0  ;;  %v1862_v10 = vpop.f32.mrb[16].mxu1 }
 0x128   :  { %v1815_v11 = vpop.f32.mrb[17].mxu0  ;;  %v1863_v12 = vpop.f32.mrb[17].mxu1 }
 0x129   :  { %v2604_v13 = vadd.f32 %v1815_v11, %v1814_v9  ;;  %v1864_v14 = vadd.f32 %v1863_v12, %v1862_v10  ;;  %v1817_v15 = vpop.f32.mrb[18].mxu0  ;;  %v1865_v16 = vpop.f32.mrb[18].mxu1 }
 0x12a   :  { %v1818_v17 = vpop.f32.mrb[19].mxu0  ;;  %v1866_v19 = vpop.f32.mrb[19].mxu1 }
 0x12b   :  { %v2607_v20 = vadd.f32 %v1864_v14, %v2562_v18  ;;  %v2609_v22 = vadd.f32 %v1818_v17, %v1817_v15  ;;  %v1867_v23 = vadd.f32 %v1866_v19, %v1865_v16 }
 0x12d   :  { %v2612_v24 = vadd.f32 %v1867_v23, %v2562_v18 }
 0x12f   :  { %v1820_v25 = vpop.f32.mrb[20].mxu0  ;;  %v1868_v26 = vpop.f32.mrb[20].mxu1 }
 0x130   :  { %v1821_v29 = vpop.f32.mrb[21].mxu0  ;;  %v1869_v31 = vpop.f32.mrb[21].mxu1 }
 0x131   :  { %v2614_v32 = vadd.f32 %v1821_v29, %v1820_v25  ;;  %v1870_v33 = vadd.f32 %v1869_v31, %v1868_v26  ;;  %v1823_v34 = vpop.f32.mrb[22].mxu0  ;;  %v1871_v36 = vpop.f32.mrb[22].mxu1  ;;  %v1100_v31 = vadd.f32 %v2564_v21, %v2562_v18  ;;  %v226_v21 = vld [vmem:[%s2835_s3 + $0x8] sm:$0xff] }
 0x132   :  { %v1824_v37 = vpop.f32.mrb[23].mxu0  ;;  %v1872_v38 = vpop.f32.mrb[23].mxu1 }
 0x133   :  { %v2617_v39 = vadd.f32 %v1870_v33, %v2562_v18  ;;  %v2619_v40 = vadd.f32 %v1824_v37, %v1823_v34  ;;  %v1873_v43 = vadd.f32 %v1872_v38, %v1871_v36  ;;  %v225_v34 = vld [vmem:[%s2835_s3] sm:$0xff] }
 0x135   :  { %v2622_v45 = vadd.f32 %v1873_v43, %v2562_v18 }
 0x137   :  { %v1826_v46 = vpop.f32.mrb[24].mxu0  ;;  %v1874_v47 = vpop.f32.mrb[24].mxu1 }
 0x138   :  { %v1827_v48 = vpop.f32.mrb[25].mxu0  ;;  %v1875_v50 = vpop.f32.mrb[25].mxu1 }
 0x139   :  { %v2624_v51 = vadd.f32 %v1827_v48, %v1826_v46  ;;  %v1876_v52 = vadd.f32 %v1875_v50, %v1874_v47  ;;  %v1829_v53 = vpop.f32.mrb[26].mxu0  ;;  %v1877_v54 = vpop.f32.mrb[26].mxu1  ;;  %v1103_v47 = vadd.f32 %v2569_v28, %v2562_v18  ;;  %v1108_v28 = vadd.f32 %v2574_v35, %v2562_v18  ;;  %v228_v35 = vld [vmem:[%s2835_s3 + $0x18] sm:$0xff] }
 0x13a   :  { %v1830_v57 = vpop.f32.mrb[27].mxu0  ;;  %v1878_v59 = vpop.f32.mrb[27].mxu1 }
 0x13b   :  { %v2627_v60 = vadd.f32 %v1876_v52, %v2562_v18  ;;  %v2629_v61 = vadd.f32 %v1830_v57, %v1829_v53  ;;  %v1879_v62 = vadd.f32 %v1878_v59, %v1877_v54  ;;  %v258_v53 = vsel %vm257_vm0, %v225_v34, 0.0 }
 0x13c   :  { %v259_v59 = vsel %vm257_vm0, %v226_v21, 0.0 }
 0x13d   :  { %v2632_v0 = vadd.f32 %v1879_v62, %v2562_v18 }
 0x13f   :  { %v1832_v1 = vpop.f32.mrb[28].mxu0  ;;  %v1880_v2 = vpop.f32.mrb[28].mxu1 }
 0x140   :  { %v1833_v3 = vpop.f32.mrb[29].mxu0  ;;  %v1881_v4 = vpop.f32.mrb[29].mxu1 }
 0x141   :  { %v2634_v7 = vadd.f32 %v1833_v3, %v1832_v1  ;;  %v1882_v9 = vadd.f32 %v1881_v4, %v1880_v2  ;;  %v1835_v10 = vpop.f32.mrb[30].mxu0  ;;  %v1883_v11 = vpop.f32.mrb[30].mxu1 }
 0x142   :  { %v1836_v12 = vpop.f32.mrb[31].mxu0  ;;  %v1884_v14 = vpop.f32.mrb[31].mxu1 }
 0x143   :  { %v2637_v15 = vadd.f32 %v1882_v9, %v2562_v18  ;;  %v2639_v16 = vadd.f32 %v1836_v12, %v1835_v10  ;;  %v1885_v17 = vadd.f32 %v1884_v14, %v1883_v11  ;;  %v227_v12 = vld [vmem:[%s2835_s3 + $0x10] sm:$0xff] }
 0x145   :  { %v2642_v19 = vadd.f32 %v1885_v17, %v2562_v18 }
 0x147   :  { %v1902_v23 = vpop.f32.mrb[32].mxu1  ;;  %v2014_v25 = vpop.f32.mrb[32].mxu0 }
 0x148   :  { %v1903_v26 = vpop.f32.mrb[33].mxu1  ;;  %v2015_v29 = vpop.f32.mrb[33].mxu0 }
 0x149   :  { %v1904_v33 = vadd.f32 %v1903_v26, %v1902_v23  ;;  %v2016_v36 = vadd.f32 %v2015_v29, %v2014_v25  ;;  %v1905_v37 = vpop.f32.mrb[34].mxu1  ;;  %v2017_v38 = vpop.f32.mrb[34].mxu0  ;;  %v1111_v29 = vadd.f32 %v2579_v42, %v2562_v18 }
 0x14a   :  { %v1906_v43 = vpop.f32.mrb[35].mxu1  ;;  %v2018_v46 = vpop.f32.mrb[35].mxu0 }
 0x14b   :  { %v1261_v48 = vadd.f32 %v1904_v33, %v1100_v31  ;;  %v1907_v50 = vadd.f32 %v1906_v43, %v1905_v37  ;;  %v2019_v52 = vadd.f32 %v2018_v46, %v2017_v38  ;;  %v261_v43 = vsel %vm257_vm0, %v228_v35, 0.0 }
 0x14d   :  { %v1422_v54 = vadd.f32 %v2016_v36, %v1261_v48  ;;  %v1264_v57 = vadd.f32 %v1907_v50, %v1103_v47  ;;  %v260_v36 = vsel %vm257_vm0, %v227_v12, 0.0 }
 0x14f   :  { %v1548_v62 = vadd.f32 %v1422_v54, %v258_v53  ;;  %v1425_v1 = vadd.f32 %v2019_v52, %v1264_v57  ;;  %v1908_v2 = vpop.f32.mrb[36].mxu1  ;;  %v2020_v3 = vpop.f32.mrb[36].mxu0  ;;  %v1116_v52 = vadd.f32 %v2584_v49, %v2562_v18  ;;  %v229_v57 = vld [vmem:[%s2835_s3 + $0x20] sm:$0xff]  ;;  %v230_v49 = vld [vmem:[%s2835_s3 + $0x28] sm:$0xff] }
 0x150   :  { %v1909_v4 = vpop.f32.mrb[37].mxu1  ;;  %v2021_v9 = vpop.f32.mrb[37].mxu0 }
 0x151   :  { %1580 = vst [vmem:[#allocation5] sm:$0xff] %v1548_v62  ;;  %v1549_v10 = vadd.f32 %v1425_v1, %v259_v59  ;;  %v1910_v11 = vadd.f32 %v1909_v4, %v1908_v2  ;;  %v2022_v14 = vadd.f32 %v2021_v9, %v2020_v3  ;;  %v1911_v17 = vpop.f32.mrb[38].mxu1  ;;  %v2023_v23 = vpop.f32.mrb[38].mxu0  ;;  %v1119_v4 = vadd.f32 %v2589_v56, %v2562_v18 }
 0x152   :  { %v1912_v25 = vpop.f32.mrb[39].mxu1  ;;  %v2024_v26 = vpop.f32.mrb[39].mxu0 }
 0x153   :  { %1581 = vst [vmem:[#allocation5 + $0x8] sm:$0xff] %v1549_v10  ;;  %v1269_v31 = vadd.f32 %v1910_v11, %v1108_v28  ;;  %v1913_v33 = vadd.f32 %v1912_v25, %v1911_v17  ;;  %v2025_v34 = vadd.f32 %v2024_v26, %v2023_v23  ;;  %v262_v11 = vsel %vm257_vm0, %v229_v57, 0.0 }
 0x154   :  { %v263_v17 = vsel %vm257_vm0, %v230_v49, 0.0  ;;  %v233_v49 = vld [vmem:[%s2835_s3 + $0x40] sm:$0xff] }
 0x155   :  { %v1430_v37 = vadd.f32 %v2022_v14, %v1269_v31  ;;  %v1272_v38 = vadd.f32 %v1913_v33, %v1111_v29  ;;  %v1124_v33 = vadd.f32 %v2594_v63, %v2562_v18  ;;  %v232_v63 = vld [vmem:[%s2835_s3 + $0x38] sm:$0xff] }
 0x156   :  { %v265_v57 = vsel %vm257_vm0, %v232_v63, 0.0 }
 0x157   :  { %v1550_v46 = vadd.f32 %v1430_v37, %v260_v36  ;;  %v1433_v47 = vadd.f32 %v2025_v34, %v1272_v38  ;;  %v1914_v48 = vpop.f32.mrb[40].mxu1  ;;  %v2026_v50 = vpop.f32.mrb[40].mxu0  ;;  %v231_v36 = vld [vmem:[%s2835_s3 + $0x30] sm:$0xff] }
 0x158   :  { %v1915_v21 = vpop.f32.mrb[41].mxu1  ;;  %v2027_v42 = vpop.f32.mrb[41].mxu0 }
 0x159   :  { %1582 = vst [vmem:[#allocation5 + $0x10] sm:$0xff] %v1550_v46  ;;  %v1551_v53 = vadd.f32 %v1433_v47, %v261_v43  ;;  %v1916_v54 = vadd.f32 %v1915_v21, %v1914_v48  ;;  %v2028_v59 = vadd.f32 %v2027_v42, %v2026_v50  ;;  %v1917_v62 = vpop.f32.mrb[42].mxu1  ;;  %v2029_v1 = vpop.f32.mrb[42].mxu0  ;;  %v1127_v48 = vadd.f32 %v2599_v6, %v2562_v18 }
 0x15a   :  { %v1918_v2 = vpop.f32.mrb[43].mxu1  ;;  %v2030_v3 = vpop.f32.mrb[43].mxu0 }
 0x15b   :  { %1583 = vst [vmem:[#allocation5 + $0x18] sm:$0xff] %v1551_v53  ;;  %v1277_v9 = vadd.f32 %v1916_v54, %v1116_v52  ;;  %v1919_v28 = vadd.f32 %v1918_v2, %v1917_v62  ;;  %v2031_v10 = vadd.f32 %v2030_v3, %v2029_v1  ;;  %v264_v52 = vsel %vm257_vm0, %v231_v36, 0.0 }
 0x15d   :  { %v1438_v12 = vadd.f32 %v2028_v59, %v1277_v9  ;;  %v1280_v14 = vadd.f32 %v1919_v28, %v1119_v4  ;;  %v1132_v4 = vadd.f32 %v2604_v13, %v2562_v18  ;;  %v234_v13 = vld [vmem:[%s2835_s3 + $0x48] sm:$0xff] }
 0x15f   :  { %v1552_v23 = vadd.f32 %v1438_v12, %v262_v11  ;;  %v1441_v25 = vadd.f32 %v2031_v10, %v1280_v14  ;;  %v1920_v26 = vpop.f32.mrb[44].mxu1  ;;  %v2032_v29 = vpop.f32.mrb[44].mxu0 }
 0x160   :  { %v1921_v31 = vpop.f32.mrb[45].mxu1  ;;  %v2033_v56 = vpop.f32.mrb[45].mxu0 }
 0x161   :  { %1584 = vst [vmem:[#allocation5 + $0x20] sm:$0xff] %v1552_v23  ;;  %v1553_v35 = vadd.f32 %v1441_v25, %v263_v17  ;;  %v1922_v34 = vadd.f32 %v1921_v31, %v1920_v26  ;;  %v2034_v37 = vadd.f32 %v2033_v56, %v2032_v29  ;;  %v1923_v38 = vpop.f32.mrb[46].mxu1  ;;  %v2035_v43 = vpop.f32.mrb[46].mxu0  ;;  %v1135_v23 = vadd.f32 %v2609_v22, %v2562_v18 }
 0x162   :  { %v1924_v46 = vpop.f32.mrb[47].mxu1  ;;  %v2036_v47 = vpop.f32.mrb[47].mxu0  ;;  %v266_v31 = vsel %vm257_vm0, %v233_v49, 0.0 }
 0x163   :  { %1585 = vst [vmem:[#allocation5 + $0x28] sm:$0xff] %v1553_v35  ;;  %v1285_v50 = vadd.f32 %v1922_v34, %v1124_v33  ;;  %v1925_v21 = vadd.f32 %v1924_v46, %v1923_v38  ;;  %v2037_v42 = vadd.f32 %v2036_v47, %v2035_v43  ;;  %v267_v35 = vsel %vm257_vm0, %v234_v13, 0.0 }
 0x164   :  { %v1140_v46 = vadd.f32 %v2614_v32, %v2562_v18  ;;  %v236_v32 = vld [vmem:[%s2835_s3 + $0x58] sm:$0xff] }
 0x165   :  { %v1446_v53 = vadd.f32 %v2034_v37, %v1285_v50  ;;  %v1288_v54 = vadd.f32 %v1925_v21, %v1127_v48  ;;  %v235_v50 = vld [vmem:[%s2835_s3 + $0x50] sm:$0xff] }
 0x167   :  { %v1554_v59 = vadd.f32 %v1446_v53, %v264_v52  ;;  %v1449_v62 = vadd.f32 %v2037_v42, %v1288_v54  ;;  %v1926_v1 = vpop.f32.mrb[48].mxu1  ;;  %v2038_v2 = vpop.f32.mrb[48].mxu0  ;;  %v1143_v54 = vadd.f32 %v2619_v40, %v2562_v18 }
 0x168   :  { %v1927_v3 = vpop.f32.mrb[49].mxu1  ;;  %v2039_v6 = vpop.f32.mrb[49].mxu0 }
 0x169   :  { %1586 = vst [vmem:[#allocation5 + $0x30] sm:$0xff] %v1554_v59  ;;  %v1555_v9 = vadd.f32 %v1449_v62, %v265_v57  ;;  %v1928_v28 = vadd.f32 %v1927_v3, %v1926_v1  ;;  %v2040_v10 = vadd.f32 %v2039_v6, %v2038_v2  ;;  %v1929_v11 = vpop.f32.mrb[50].mxu1  ;;  %v2041_v12 = vpop.f32.mrb[50].mxu0  ;;  %v268_v1 = vsel %vm257_vm0, %v235_v50, 0.0 }
 0x16a   :  { %v1930_v14 = vpop.f32.mrb[51].mxu1  ;;  %v2042_v17 = vpop.f32.mrb[51].mxu0  ;;  %v269_v6 = vsel %vm257_vm0, %v236_v32, 0.0  ;;  %v1156_v50 = vadd.f32 %v2634_v7, %v2562_v18  ;;  %v1159_v32 = vadd.f32 %v2639_v16, %v2562_v18  ;;  %v240_v7 = vld [vmem:[%s2835_s3 + $0x78] sm:$0xff] }
 0x16b   :  { %1587 = vst [vmem:[#allocation5 + $0x38] sm:$0xff] %v1555_v9  ;;  %v1293_v25 = vadd.f32 %v1928_v28, %v1132_v4  ;;  %v1931_v26 = vadd.f32 %v1930_v14, %v1929_v11  ;;  %v2043_v29 = vadd.f32 %v2042_v17, %v2041_v12  ;;  %v1148_v11 = vadd.f32 %v2624_v51, %v2562_v18  ;;  %v237_v17 = vld [vmem:[%s2835_s3 + $0x60] sm:$0xff]  ;;  %v238_v51 = vld [vmem:[%s2835_s3 + $0x68] sm:$0xff] }
 0x16d   :  { %v1454_v56 = vadd.f32 %v2040_v10, %v1293_v25  ;;  %v1296_v33 = vadd.f32 %v1931_v26, %v1135_v23 }
 0x16f   :  { %v1556_v34 = vadd.f32 %v1454_v56, %v266_v31  ;;  %v1457_v36 = vadd.f32 %v2043_v29, %v1296_v33  ;;  %v1932_v37 = vpop.f32.mrb[52].mxu1  ;;  %v2044_v38 = vpop.f32.mrb[52].mxu0  ;;  %v1151_v31 = vadd.f32 %v2629_v61, %v2562_v18 }
 0x170   :  { %v1933_v43 = vpop.f32.mrb[53].mxu1  ;;  %v2045_v22 = vpop.f32.mrb[53].mxu0 }
 0x171   :  { %1588 = vst [vmem:[#allocation5 + $0x40] sm:$0xff] %v1556_v34  ;;  %v1557_v47 = vadd.f32 %v1457_v36, %v267_v35  ;;  %v1934_v48 = vadd.f32 %v1933_v43, %v1932_v37  ;;  %v2046_v21 = vadd.f32 %v2045_v22, %v2044_v38  ;;  %v1935_v63 = vpop.f32.mrb[54].mxu1  ;;  %v2047_v42 = vpop.f32.mrb[54].mxu0  ;;  %v270_v34 = vsel %vm257_vm0, %v237_v17, 0.0 }
 0x172   :  { %v1936_v52 = vpop.f32.mrb[55].mxu1  ;;  %v2048_v53 = vpop.f32.mrb[55].mxu0  ;;  %v271_v38 = vsel %vm257_vm0, %v238_v51, 0.0 }
 0x173   :  { %1589 = vst [vmem:[#allocation5 + $0x48] sm:$0xff] %v1557_v47  ;;  %v1301_v57 = vadd.f32 %v1934_v48, %v1140_v46  ;;  %v1937_v59 = vadd.f32 %v1936_v52, %v1935_v63  ;;  %v2049_v62 = vadd.f32 %v2048_v53, %v2047_v42  ;;  %v239_v42 = vld [vmem:[%s2835_s3 + $0x70] sm:$0xff] }
 0x175   :  { %v1462_v2 = vadd.f32 %v2046_v21, %v1301_v57  ;;  %v1304_v3 = vadd.f32 %v1937_v59, %v1143_v54 }
 0x177   :  { %v1558_v4 = vadd.f32 %v1462_v2, %v268_v1  ;;  %v1465_v9 = vadd.f32 %v2049_v62, %v1304_v3  ;;  %v1938_v28 = vpop.f32.mrb[56].mxu1  ;;  %v2050_v49 = vpop.f32.mrb[56].mxu0  ;;  %v272_v3 = vsel %vm257_vm0, %v239_v42, 0.0 }
 0x178   :  { %v1939_v10 = vpop.f32.mrb[57].mxu1  ;;  %v2051_v40 = vpop.f32.mrb[57].mxu0 }
 0x179   :  { %1590 = vst [vmem:[#allocation5 + $0x50] sm:$0xff] %v1558_v4  ;;  %v1559_v12 = vadd.f32 %v1465_v9, %v269_v6  ;;  %v1940_v14 = vadd.f32 %v1939_v10, %v1938_v28  ;;  %v2052_v23 = vadd.f32 %v2051_v40, %v2050_v49  ;;  %v1941_v25 = vpop.f32.mrb[58].mxu1  ;;  %v2053_v26 = vpop.f32.mrb[58].mxu0  ;;  %v273_v9 = vsel %vm257_vm0, %v240_v7, 0.0 }
 0x17a   :  { %v1942_v13 = vpop.f32.mrb[59].mxu1  ;;  %v2054_v29 = vpop.f32.mrb[59].mxu0 }
 0x17b   :  { %1591 = vst [vmem:[#allocation5 + $0x58] sm:$0xff] %v1559_v12  ;;  %v1309_v56 = vadd.f32 %v1940_v14, %v1148_v11  ;;  %v1943_v33 = vadd.f32 %v1942_v13, %v1941_v25  ;;  %v2055_v35 = vadd.f32 %v2054_v29, %v2053_v26  ;;  %v241_v14 = vld [vmem:[%s2835_s3 + $0x80] sm:$0xff] }
 0x17c   :  { %v274_v51 = vsel %vm257_vm0, %v241_v14, 0.0  ;;  %v246_v14 = vld [vmem:[%s2835_s3 + $0xa8] sm:$0xff] }
 0x17d   :  { %v1470_v36 = vadd.f32 %v2052_v23, %v1309_v56  ;;  %v1312_v37 = vadd.f32 %v1943_v33, %v1151_v31  ;;  %v242_v56 = vld [vmem:[%s2835_s3 + $0x88] sm:$0xff] }
 0x17f   :  { %v1560_v43 = vadd.f32 %v1470_v36, %v270_v34  ;;  %v1473_v22 = vadd.f32 %v2055_v35, %v1312_v37  ;;  %v1944_v46 = vpop.f32.mrb[60].mxu1  ;;  %v2056_v47 = vpop.f32.mrb[60].mxu0  ;;  %v275_v36 = vsel %vm257_vm0, %v242_v56, 0.0 }
 0x180   :  { %v1945_v48 = vpop.f32.mrb[61].mxu1  ;;  %v2057_v61 = vpop.f32.mrb[61].mxu0 }
 0x181   :  { %1592 = vst [vmem:[#allocation5 + $0x60] sm:$0xff] %v1560_v43  ;;  %v1561_v21 = vadd.f32 %v1473_v22, %v271_v38  ;;  %v1946_v63 = vadd.f32 %v1945_v48, %v1944_v46  ;;  %v2058_v52 = vadd.f32 %v2057_v61, %v2056_v47  ;;  %v1947_v53 = vpop.f32.mrb[62].mxu1  ;;  %v2059_v54 = vpop.f32.mrb[62].mxu0  ;;  %v243_v61 = vld [vmem:[%s2835_s3 + $0x90] sm:$0xff] }
 0x182   :  { %v1948_v57 = vpop.f32.mrb[63].mxu1  ;;  %v2060_v59 = vpop.f32.mrb[63].mxu0 }
 0x183   :  { %1593 = vst [vmem:[#allocation5 + $0x68] sm:$0xff] %v1561_v21  ;;  %v1317_v62 = vadd.f32 %v1946_v63, %v1156_v50  ;;  %v1949_v1 = vadd.f32 %v1948_v57, %v1947_v53  ;;  %v2061_v2 = vadd.f32 %v2060_v59, %v2059_v54  ;;  %v244_v54 = vld [vmem:[%s2835_s3 + $0x98] sm:$0xff]  ;;  %v276_v59 = vsel %vm257_vm0, %v243_v61, 0.0 }
 0x185   :  { %v1478_v6 = vadd.f32 %v2058_v52, %v1317_v62  ;;  %v1320_v4 = vadd.f32 %v1949_v1, %v1159_v32  ;;  %v277_v1 = vsel %vm257_vm0, %v244_v54, 0.0 }
 0x187   :  { %v1562_v28 = vadd.f32 %v1478_v6, %v272_v3  ;;  %v1481_v49 = vadd.f32 %v2061_v2, %v1320_v4  ;;  %v1950_v10 = vpop.f32.mrb[64].mxu1  ;;  %v2062_v40 = vpop.f32.mrb[64].mxu0 }
 0x188   :  { %v1951_v11 = vpop.f32.mrb[65].mxu1  ;;  %v2063_v18 = vpop.f32.mrb[65].mxu0 }
 0x189   :  { %1594 = vst [vmem:[#allocation5 + $0x70] sm:$0xff] %v1562_v28  ;;  %v1563_v16 = vadd.f32 %v1481_v49, %v273_v9  ;;  %v1952_v12 = vadd.f32 %v1951_v11, %v1950_v10  ;;  %v2064_v17 = vadd.f32 %v2063_v18, %v2062_v40  ;;  %v1953_v23 = vpop.f32.mrb[66].mxu1  ;;  %v2065_v25 = vpop.f32.mrb[66].mxu0  ;;  %v245_v49 = vld [vmem:[%s2835_s3 + $0xa0] sm:$0xff] }
 0x18a   :  { %v1954_v26 = vpop.f32.mrb[67].mxu1  ;;  %v2066_v13 = vpop.f32.mrb[67].mxu0 }
 0x18b   :  { %1595 = vst [vmem:[#allocation5 + $0x78] sm:$0xff] %v1563_v16  ;;  %v1325_v29 = vadd.f32 %v1952_v12, %v2567_v27  ;;  %v1955_v31 = vadd.f32 %v1954_v26, %v1953_v23  ;;  %v2067_v33 = vadd.f32 %v2066_v13, %v2065_v25  ;;  %v278_v23 = vsel %vm257_vm0, %v245_v49, 0.0 }
 0x18c   :  { %v279_v13 = vsel %vm257_vm0, %v246_v14, 0.0 }
 0x18d   :  { %v1486_v35 = vadd.f32 %v2064_v17, %v1325_v29  ;;  %v1328_v34 = vadd.f32 %v1955_v31, %v2572_v30 }
 0x18f   :  { %v1564_v37 = vadd.f32 %v1486_v35, %v274_v51  ;;  %v1489_v38 = vadd.f32 %v2067_v33, %v1328_v34  ;;  %v1956_v43 = vpop.f32.mrb[68].mxu1  ;;  %v2068_v22 = vpop.f32.mrb[68].mxu0 }
 0x190   :  { %v1957_v46 = vpop.f32.mrb[69].mxu1  ;;  %v2069_v47 = vpop.f32.mrb[69].mxu0 }
 0x191   :  { %1596 = vst [vmem:[#allocation5 + $0x80] sm:$0xff] %v1564_v37  ;;  %v1565_v27 = vadd.f32 %v1489_v38, %v275_v36  ;;  %v1958_v48 = vadd.f32 %v1957_v46, %v1956_v43  ;;  %v2070_v50 = vadd.f32 %v2069_v47, %v2068_v22  ;;  %v1959_v21 = vpop.f32.mrb[70].mxu1  ;;  %v2071_v63 = vpop.f32.mrb[70].mxu0  ;;  %v247_v36 = vld [vmem:[%s2835_s3 + $0xb0] sm:$0xff] }
 0x192   :  { %v1960_v42 = vpop.f32.mrb[71].mxu1  ;;  %v2072_v30 = vpop.f32.mrb[71].mxu0  ;;  %v280_v61 = vsel %vm257_vm0, %v247_v36, 0.0 }
 0x193   :  { %1597 = vst [vmem:[#allocation5 + $0x88] sm:$0xff] %v1565_v27  ;;  %v1333_v52 = vadd.f32 %v1958_v48, %v2577_v41  ;;  %v1961_v53 = vadd.f32 %v1960_v42, %v1959_v21  ;;  %v2073_v57 = vadd.f32 %v2072_v30, %v2071_v63  ;;  %v248_v27 = vld [vmem:[%s2835_s3 + $0xb8] sm:$0xff] }
 0x194   :  { %v281_v63 = vsel %vm257_vm0, %v248_v27, 0.0 }
 0x195   :  { %v1494_v32 = vadd.f32 %v2070_v50, %v1333_v52  ;;  %v1336_v62 = vadd.f32 %v1961_v53, %v2582_v44 }
 0x197   :  { %v1566_v7 = vadd.f32 %v1494_v32, %v276_v59  ;;  %v1497_v2 = vadd.f32 %v2073_v57, %v1336_v62  ;;  %v1962_v3 = vpop.f32.mrb[72].mxu1  ;;  %v2074_v6 = vpop.f32.mrb[72].mxu0  ;;  %v249_v32 = vld [vmem:[%s2835_s3 + $0xc0] sm:$0xff] }
 0x198   :  { %v1963_v4 = vpop.f32.mrb[73].mxu1  ;;  %v2075_v9 = vpop.f32.mrb[73].mxu0 }
 0x199   :  { %1598 = vst [vmem:[#allocation5 + $0x90] sm:$0xff] %v1566_v7  ;;  %v1567_v41 = vadd.f32 %v1497_v2, %v277_v1  ;;  %v1964_v28 = vadd.f32 %v1963_v4, %v1962_v3  ;;  %v2076_v10 = vadd.f32 %v2075_v9, %v2074_v6  ;;  %v1965_v40 = vpop.f32.mrb[74].mxu1  ;;  %v2077_v11 = vpop.f32.mrb[74].mxu0  ;;  %v250_v4 = vld [vmem:[%s2835_s3 + $0xc8] sm:$0xff] }
 0x19a   :  { %v1966_v18 = vpop.f32.mrb[75].mxu1  ;;  %v2078_v44 = vpop.f32.mrb[75].mxu0 }
 0x19b   :  { %1599 = vst [vmem:[#allocation5 + $0x98] sm:$0xff] %v1567_v41  ;;  %v1341_v16 = vadd.f32 %v1964_v28, %v2587_v55  ;;  %v1967_v12 = vadd.f32 %v1966_v18, %v1965_v40  ;;  %v2079_v17 = vadd.f32 %v2078_v44, %v2077_v11  ;;  %v282_v41 = vsel %vm257_vm0, %v249_v32, 0.0 }
 0x19d   :  { %v1502_v25 = vadd.f32 %v2076_v10, %v1341_v16  ;;  %v1344_v26 = vadd.f32 %v1967_v12, %v2592_v58  ;;  %v283_v10 = vsel %vm257_vm0, %v250_v4, 0.0 }
 0x19f   :  { %v1568_v29 = vadd.f32 %v1502_v25, %v278_v23  ;;  %v1505_v31 = vadd.f32 %v2079_v17, %v1344_v26  ;;  %v1968_v56 = vpop.f32.mrb[76].mxu1  ;;  %v2080_v33 = vpop.f32.mrb[76].mxu0  ;;  %v251_v17 = vld [vmem:[%s2835_s3 + $0xd0] sm:$0xff] }
 0x1a0   :  { %v1969_v51 = vpop.f32.mrb[77].mxu1  ;;  %v2081_v35 = vpop.f32.mrb[77].mxu0 }
 0x1a1   :  { %1600 = vst [vmem:[#allocation5 + $0xa0] sm:$0xff] %v1568_v29  ;;  %v1569_v55 = vadd.f32 %v1505_v31, %v279_v13  ;;  %v1970_v34 = vadd.f32 %v1969_v51, %v1968_v56  ;;  %v2082_v37 = vadd.f32 %v2081_v35, %v2080_v33  ;;  %v1971_v38 = vpop.f32.mrb[78].mxu1  ;;  %v2083_v43 = vpop.f32.mrb[78].mxu0  ;;  %v252_v56 = vld [vmem:[%s2835_s3 + $0xd8] sm:$0xff]  ;;  %v284_v51 = vsel %vm257_vm0, %v251_v17, 0.0 }
 0x1a2   :  { %v1972_v22 = vpop.f32.mrb[79].mxu1  ;;  %v2084_v58 = vpop.f32.mrb[79].mxu0 }
 0x1a3   :  { %1601 = vst [vmem:[#allocation5 + $0xa8] sm:$0xff] %v1569_v55  ;;  %v1349_v46 = vadd.f32 %v1970_v34, %v2597_v5  ;;  %v1973_v47 = vadd.f32 %v1972_v22, %v1971_v38  ;;  %v2085_v48 = vadd.f32 %v2084_v58, %v2083_v43  ;;  %v285_v34 = vsel %vm257_vm0, %v252_v56, 0.0 }
 0x1a5   :  { %v1510_v50 = vadd.f32 %v2082_v37, %v1349_v46  ;;  %v1352_v21 = vadd.f32 %v1973_v47, %v2602_v8  ;;  %v253_v47 = vld [vmem:[%s2835_s3 + $0xe0] sm:$0xff] }
 0x1a7   :  { %v1570_v42 = vadd.f32 %v1510_v50, %v280_v61  ;;  %v1513_v30 = vadd.f32 %v2085_v48, %v1352_v21  ;;  %v1974_v52 = vpop.f32.mrb[80].mxu1  ;;  %v2086_v53 = vpop.f32.mrb[80].mxu0 }
 0x1a8   :  { %v1975_v54 = vpop.f32.mrb[81].mxu1  ;;  %v2087_v57 = vpop.f32.mrb[81].mxu0 }
 0x1a9   :  { %1602 = vst [vmem:[#allocation5 + $0xb0] sm:$0xff] %v1570_v42  ;;  %v1571_v5 = vadd.f32 %v1513_v30, %v281_v63  ;;  %v1976_v59 = vadd.f32 %v1975_v54, %v1974_v52  ;;  %v2088_v62 = vadd.f32 %v2087_v57, %v2086_v53  ;;  %v1977_v1 = vpop.f32.mrb[82].mxu1  ;;  %v2089_v7 = vpop.f32.mrb[82].mxu0  ;;  %v254_v42 = vld [vmem:[%s2835_s3 + $0xe8] sm:$0xff]  ;;  %v286_v52 = vsel %vm257_vm0, %v253_v47, 0.0 }
 0x1aa   :  { %v1978_v2 = vpop.f32.mrb[83].mxu1  ;;  %v2090_v8 = vpop.f32.mrb[83].mxu0  ;;  %v287_v57 = vsel %vm257_vm0, %v254_v42, 0.0 }
 0x1ab   :  { %1603 = vst [vmem:[#allocation5 + $0xb8] sm:$0xff] %v1571_v5  ;;  %v1357_v3 = vadd.f32 %v1976_v59, %v2607_v20  ;;  %v1979_v6 = vadd.f32 %v1978_v2, %v1977_v1  ;;  %v2091_v9 = vadd.f32 %v2090_v8, %v2089_v7  ;;  %v255_v8 = vld [vmem:[%s2835_s3 + $0xf0] sm:$0xff] }
 0x1ad   :  { %v1518_v28 = vadd.f32 %v2088_v62, %v1357_v3  ;;  %v1360_v49 = vadd.f32 %v1979_v6, %v2612_v24 }
 0x1af   :  { %v1572_v40 = vadd.f32 %v1518_v28, %v282_v41  ;;  %v1521_v11 = vadd.f32 %v2091_v9, %v1360_v49  ;;  %v1980_v18 = vpop.f32.mrb[84].mxu1  ;;  %v2092_v44 = vpop.f32.mrb[84].mxu0  ;;  %v256_v49 = vld [vmem:[%s2835_s3 + $0xf8] sm:$0xff] }
 0x1b0   :  { %v1981_v16 = vpop.f32.mrb[85].mxu1  ;;  %v2093_v12 = vpop.f32.mrb[85].mxu0 }
 0x1b1   :  { %1604 = vst [vmem:[#allocation5 + $0xc0] sm:$0xff] %v1572_v40  ;;  %v1573_v20 = vadd.f32 %v1521_v11, %v283_v10  ;;  %v1982_v14 = vadd.f32 %v1981_v16, %v1980_v18  ;;  %v2094_v23 = vadd.f32 %v2093_v12, %v2092_v44  ;;  %v1983_v25 = vpop.f32.mrb[86].mxu1  ;;  %v2095_v26 = vpop.f32.mrb[86].mxu0  ;;  %v288_v40 = vsel %vm257_vm0, %v255_v8, 0.0 }
 0x1b2   :  { %v1984_v13 = vpop.f32.mrb[87].mxu1  ;;  %v2096_v24 = vpop.f32.mrb[87].mxu0  ;;  %v289_v44 = vsel %vm257_vm0, %v256_v49, 0.0 }
 0x1b3   :  { %1605 = vst [vmem:[#allocation5 + $0xc8] sm:$0xff] %v1573_v20  ;;  %v1365_v29 = vadd.f32 %v1982_v14, %v2617_v39  ;;  %v1985_v31 = vadd.f32 %v1984_v13, %v1983_v25  ;;  %v2097_v33 = vadd.f32 %v2096_v24, %v2095_v26 }
 0x1b5   :  { %v1526_v35 = vadd.f32 %v2094_v23, %v1365_v29  ;;  %v1368_v55 = vadd.f32 %v1985_v31, %v2622_v45 }
 0x1b7   :  { %v1574_v36 = vadd.f32 %v1526_v35, %v284_v51  ;;  %v1529_v37 = vadd.f32 %v2097_v33, %v1368_v55  ;;  %v1986_v38 = vpop.f32.mrb[88].mxu1  ;;  %v2098_v43 = vpop.f32.mrb[88].mxu0 }
 0x1b8   :  { %v1987_v22 = vpop.f32.mrb[89].mxu1  ;;  %v2099_v58 = vpop.f32.mrb[89].mxu0 }
 0x1b9   :  { %1606 = vst [vmem:[#allocation5 + $0xd0] sm:$0xff] %v1574_v36  ;;  %v1575_v39 = vadd.f32 %v1529_v37, %v285_v34  ;;  %v1988_v46 = vadd.f32 %v1987_v22, %v1986_v38  ;;  %v2100_v27 = vadd.f32 %v2099_v58, %v2098_v43  ;;  %v1989_v48 = vpop.f32.mrb[90].mxu1  ;;  %v2101_v61 = vpop.f32.mrb[90].mxu0 }
 0x1ba   :  { %v1990_v50 = vpop.f32.mrb[91].mxu1  ;;  %v2102_v45 = vpop.f32.mrb[91].mxu0 }
 0x1bb   :  { %1607 = vst [vmem:[#allocation5 + $0xd8] sm:$0xff] %v1575_v39  ;;  %v1373_v21 = vadd.f32 %v1988_v46, %v2627_v60  ;;  %v1991_v63 = vadd.f32 %v1990_v50, %v1989_v48  ;;  %v2103_v30 = vadd.f32 %v2102_v45, %v2101_v61 }
 0x1bd   :  { %v1534_v53 = vadd.f32 %v2100_v27, %v1373_v21  ;;  %v1376_v54 = vadd.f32 %v1991_v63, %v2632_v0 }
 0x1bf   :  { %v1576_v5 = vadd.f32 %v1534_v53, %v286_v52  ;;  %v1537_v59 = vadd.f32 %v2103_v30, %v1376_v54  ;;  %v1992_v32 = vpop.f32.mrb[92].mxu1  ;;  %v2104_v62 = vpop.f32.mrb[92].mxu0 }
 0x1c0   :  { %v1993_v1 = vpop.f32.mrb[93].mxu1  ;;  %v2105_v7 = vpop.f32.mrb[93].mxu0 }
 0x1c1   :  { %1608 = vst [vmem:[#allocation5 + $0xe0] sm:$0xff] %v1576_v5  ;;  %v1577_v60 = vadd.f32 %v1537_v59, %v287_v57  ;;  %v1994_v2 = vadd.f32 %v1993_v1, %v1992_v32  ;;  %v2106_v3 = vadd.f32 %v2105_v7, %v2104_v62  ;;  %v1995_v6 = vpop.f32.mrb[94].mxu1  ;;  %v2107_v4 = vpop.f32.mrb[94].mxu0 }
 0x1c2   :  { %v1996_v9 = vpop.f32.mrb[95].mxu1  ;;  %v2108_v0 = vpop.f32.mrb[95].mxu0 }
 0x1c3   :  { %1609 = vst [vmem:[#allocation5 + $0xe8] sm:$0xff] %v1577_v60  ;;  %v1381_v41 = vadd.f32 %v1994_v2, %v2637_v15  ;;  %v1997_v28 = vadd.f32 %v1996_v9, %v1995_v6  ;;  %v2109_v10 = vadd.f32 %v2108_v0, %v2107_v4 }
 0x1c5   :  { %v1542_v11 = vadd.f32 %v2106_v3, %v1381_v41  ;;  %v1384_v18 = vadd.f32 %v1997_v28, %v2642_v19 }
 0x1c7   :  { %v1578_v16 = vadd.f32 %v1542_v11, %v288_v40  ;;  %v1545_v12 = vadd.f32 %v2109_v10, %v1384_v18 }
 0x1c9   :  { %1610 = vst [vmem:[#allocation5 + $0xf0] sm:$0xff] %v1578_v16  ;;  %v1579_v15 = vadd.f32 %v1545_v12, %v289_v44 }
 0x1cb   :  { %1611 = vst [vmem:[#allocation5 + $0xf8] sm:$0xff] %v1579_v15 }
 0x1cc   :  { %2357 = shalt.err (!%p2354_p12)
}
 0x1cd   :  { %s2358_s27 = scalar_lea.hbm %s2836_s4, 4096 }
 0x1ce   :  { %p2359_p13 = scmp.ne.s32.totalorder %s2836_s4, %s2358_s27  ;;  %p2362_p0 = scmp.lt.u32.totalorder %s2358_s27, %s2836_s4 }
 0x1d0   :  { %p2364_p1 = pnand %p2362_p0, %p2359_p13 }
 0x1d2   :  { %2367 = shalt.err (!%p2364_p1)
}
 0x1d3   :  { %s2376_s6 = smov 128   ;;  %s2377_s7 = smov 8  }
 0x1d4   :  { %1623 = dma.vmem_to_hbm [thread:$0]  %s1618_s24, 4096, %s2836_s4, [#allocation4], %s2376_s6, %s2376_s6, %s2377_s7  }
 0x1d5   :  { %2370 = dma.done.wait [#allocation4], 4096  }
 0x1d6   :  { %2371 = vsyncadd [#allocation4], 4294963200 }
 0x1d7   :  { %1627 = vsyncpa [#allocation3], 1 }
 0x1d8   :  { %1628 = vsyncpa [#allocation4], 1 }

</bundles_post_ra>
